<compile_context>
chip_gen: v5e
topology: v5e:2x2
jax: 0.10.0
libtpu: 0.0.40
codegen_flags: <defaults>
</compile_context>

<pallas_src>
import math
import functools

import jax
import jax.numpy as jnp
from jax.experimental import pallas as pl
from jax.experimental.pallas import tpu as pltpu


def _mha_kernel(*refs, fused_qkv, has_mask, compute_dtype):
    if fused_qkv:
        if has_mask:
            (x_ref, wqkv_ref, bqkv_ref, wo_ref, bo_ref, mask_ref,
             o_ref, acc_ref) = refs
        else:
            (x_ref, wqkv_ref, bqkv_ref, wo_ref, bo_ref,
             o_ref, acc_ref) = refs
            mask_ref = None
    else:
        if has_mask:
            (q_ref, k_ref, v_ref, wq_ref, bq_ref, wk_ref, bk_ref,
             wv_ref, bv_ref, wo_ref, bo_ref, mask_ref, o_ref, acc_ref) = refs
        else:
            (q_ref, k_ref, v_ref, wq_ref, bq_ref, wk_ref, bk_ref,
             wv_ref, bv_ref, wo_ref, bo_ref, o_ref, acc_ref) = refs
            mask_ref = None

    h = pl.program_id(1)                      # head index (reduction axis)
    block_b, seq_q, d_model = o_ref.shape
    d_k = wo_ref.shape[1]
    m_q = block_b * seq_q
    f32 = jnp.float32

    # --- per-head Q/K/V projections on (block_b * S) rows -------------------
    if fused_qkv:
        seq_kv = seq_q
        x2 = x_ref[...].reshape(m_q, d_model).astype(compute_dtype)
        qkv = jnp.dot(x2, wqkv_ref[0],
                      preferred_element_type=f32) + bqkv_ref[0]   # (m, 3*d_k)
        qh = qkv[:, 0:d_k]
        kh = qkv[:, d_k:2 * d_k]
        vh = qkv[:, 2 * d_k:3 * d_k]
    else:
        _, seq_kv, _ = k_ref.shape
        m_kv = block_b * seq_kv
        q2 = q_ref[...].reshape(m_q, d_model).astype(compute_dtype)
        k2 = k_ref[...].reshape(m_kv, d_model).astype(compute_dtype)
        v2 = v_ref[...].reshape(m_kv, d_model).astype(compute_dtype)
        qh = jnp.dot(q2, wq_ref[0], preferred_element_type=f32) + bq_ref[0]
        kh = jnp.dot(k2, wk_ref[0], preferred_element_type=f32) + bk_ref[0]
        vh = jnp.dot(v2, wv_ref[0], preferred_element_type=f32) + bv_ref[0]

    # (m, d_k) -> (block_b, S, d_k): leading-dim split only (minor dim intact)
    qh3 = qh.reshape(block_b, seq_q, d_k).astype(compute_dtype)
    kh3 = kh.reshape(block_b, seq_kv, d_k).astype(compute_dtype)
    vh3 = vh.reshape(block_b, seq_kv, d_k).astype(compute_dtype)

    # --- scaled dot-product attention (scale folded into W_q / b_q) ---------
    s = jnp.einsum("bqd,bkd->bqk", qh3, kh3,
                   preferred_element_type=f32)                    # (Bb,Sq,Skv)
    if mask_ref is not None:
        s = jnp.where(mask_ref[...] == 0.0, jnp.float32(-1e9), s)
    s = s - jnp.max(s, axis=-1, keepdims=True)
    p = jnp.exp(s)
    p = p * pl.reciprocal(jnp.sum(p, axis=-1, keepdims=True), approx=True)
    attn = jnp.einsum("bqk,bkd->bqd", p.astype(compute_dtype), vh3,
                      preferred_element_type=f32)                 # (Bb,Sq,d_k)

    # --- per-head slice of the output projection, accumulated over heads ----
    out_h = jnp.dot(attn.reshape(m_q, d_k).astype(compute_dtype), wo_ref[0],
                    preferred_element_type=f32)                   # (m, D)

    @pl.when(h == 0)
    def _():
        acc_ref[...] = out_h + bo_ref[...]         # add output bias once

    @pl.when(h > 0)
    def _():
        acc_ref[...] += out_h

    @pl.when(h == pl.num_programs(1) - 1)
    def _():
        o_ref[...] = acc_ref[...].reshape(block_b, seq_q,
                                          d_model).astype(o_ref.dtype)


def _pick_block_b(batch, seq, target_rows=512):
    """Largest divisor of `batch` that (a) leaves >= 2 grid steps for megacore
    and (b) keeps block_b * seq <= target_rows (VMEM-friendly)."""
    if batch <= 1:
        return 1
    best = 1
    for cand in range(1, batch // 2 + 1):
        if batch % cand == 0 and cand * seq <= target_rows:
            best = cand
    return best


def multi_head_attention(q, k, v, params, *, num_heads, mask=None,
                         block_b=None, compute_dtype=jnp.bfloat16):
    """q: (B, Sq, D); k, v: (B, Skv, D) float32.
    params: weights (D, D) pre-transposed (in, out) and biases (1, D).
    mask: optional, broadcastable to (B, Sq, Skv); 0 entries are masked out.
    """
    B, Sq, D = q.shape
    Bk, Skv, Dk = k.shape
    assert k.shape == v.shape and Bk == B and Dk == D
    assert D % num_heads == 0, "d_model must be divisible by num_heads"
    d_k = D // num_heads
    if block_b is None:
        block_b = _pick_block_b(B, max(Sq, Skv))
    assert B % block_b == 0, "block_b must divide batch"
    n_bblk = B // block_b

    fused = (q is k) and (k is v)          # self-attention -> fused QKV matmul
    scale = 1.0 / math.sqrt(d_k)

    # Per-head weight layouts (prepared once, outside the kernel).  The
    # 1/sqrt(d_k) scale is folded into W_q / b_q (exact); weights are cast to
    # the MXU compute dtype here so the kernel DMAs half the bytes.
    def heads_in(w):    # (D, D) -> (H, D, d_k)
        return w.reshape(D, num_heads, d_k).transpose(1, 0, 2)

    def heads_bias(b):  # (1, D) -> (H, 1, d_k)
        return b.reshape(num_heads, 1, d_k)

    wq_h = (heads_in(params["wq"]) * scale).astype(compute_dtype)
    wk_h = heads_in(params["wk"]).astype(compute_dtype)
    wv_h = heads_in(params["wv"]).astype(compute_dtype)
    bq_h = (heads_bias(params["bq"]) * scale).astype(jnp.float32)
    bk_h = heads_bias(params["bk"]).astype(jnp.float32)
    bv_h = heads_bias(params["bv"]).astype(jnp.float32)
    wo_h = params["wo"].reshape(num_heads, d_k, D).astype(compute_dtype)
    bo = params["bo"].astype(jnp.float32)                      # (1, D)

    q_spec = pl.BlockSpec((block_b, Sq, D), lambda i, h: (i, 0, 0))
    kv_spec = pl.BlockSpec((block_b, Skv, D), lambda i, h: (i, 0, 0))
    out_spec = pl.BlockSpec((block_b, Sq, D), lambda i, h: (i, 0, 0))
    wo_spec = pl.BlockSpec((1, d_k, D), lambda i, h: (h, 0, 0))
    bo_spec = pl.BlockSpec((1, D), lambda i, h: (0, 0))

    if fused:
        w_qkv = jnp.concatenate([wq_h, wk_h, wv_h], axis=-1)   # (H, D, 3*d_k)
        b_qkv = jnp.concatenate([bq_h, bk_h, bv_h], axis=-1)   # (H, 1, 3*d_k)
        in_specs = [
            q_spec,
            pl.BlockSpec((1, D, 3 * d_k), lambda i, h: (h, 0, 0)),
            pl.BlockSpec((1, 1, 3 * d_k), lambda i, h: (h, 0, 0)),
            wo_spec, bo_spec,
        ]
        args = [q, w_qkv, b_qkv, wo_h, bo]
    else:
        wh_spec = pl.BlockSpec((1, D, d_k), lambda i, h: (h, 0, 0))
        bh_spec = pl.BlockSpec((1, 1, d_k), lambda i, h: (h, 0, 0))
        in_specs = [q_spec, kv_spec, kv_spec,
                    wh_spec, bh_spec, wh_spec, bh_spec, wh_spec, bh_spec,
                    wo_spec, bo_spec]
        args = [q, k, v, wq_h, bq_h, wk_h, bk_h, wv_h, bv_h, wo_h, bo]

    has_mask = mask is not None
    if has_mask:
        # TODO(synk): per-head (B, H, Sq, Skv) masks are not supported; the
        # mask is broadcast over heads (PyTorch's common (B, 1, Sq, Skv) use).
        m = jnp.asarray(mask, jnp.float32)
        if m.ndim == 4 and m.shape[1] == 1:
            m = m[:, 0]
        mask_arr = jnp.broadcast_to(m, (B, Sq, Skv))
        in_specs.append(pl.BlockSpec((block_b, Sq, Skv), lambda i, h: (i, 0, 0)))
        args.append(mask_arr)

    kernel = functools.partial(_mha_kernel, fused_qkv=fused, has_mask=has_mask,
                               compute_dtype=compute_dtype)

    return pl.pallas_call(
        kernel,
        out_shape=jax.ShapeDtypeStruct((B, Sq, D), q.dtype),
        grid_spec=pltpu.PrefetchScalarGridSpec(
            num_scalar_prefetch=0,
            grid=(n_bblk, num_heads),          # heads = reduction axis, last
            in_specs=in_specs,
            out_specs=out_spec,
            scratch_shapes=[pltpu.VMEM((block_b * Sq, D), jnp.float32)],
        ),
        compiler_params=pltpu.CompilerParams(
            dimension_semantics=("parallel", "arbitrary"),
            vmem_limit_bytes=32 * 1024 * 1024,
        ),
    )(*args)


def init_params(key, d_model):
    """Deterministic init mimicking torch.nn.Linear default U[-1/sqrt(fan_in), +)."""
    bound = 1.0 / math.sqrt(d_model)
    keys = jax.random.split(key, 8)

    def w(k):   # stored pre-transposed: (D_in, D_out)
        return jax.random.uniform(k, (d_model, d_model), jnp.float32, -bound, bound)

    def b(k):
        return jax.random.uniform(k, (1, d_model), jnp.float32, -bound, bound)

    return {
        "wq": w(keys[0]), "bq": b(keys[1]),
        "wk": w(keys[2]), "bk": b(keys[3]),
        "wv": w(keys[4]), "bv": b(keys[5]),
        "wo": w(keys[6]), "bo": b(keys[7]),
    }


def mha_reference(q, k, v, params, *, num_heads, mask=None):
    """Plain-JAX reference mirroring the PyTorch module, for validation."""
    B, Sq, D = q.shape
    _, Skv, _ = k.shape
    d_k = D // num_heads

    def proj(x, w, bias):
        return x @ w + bias

    def split(x, S):
        return x.reshape(B, S, num_heads, d_k).transpose(0, 2, 1, 3)

    Q = split(proj(q, params["wq"], params["bq"]), Sq)
    K = split(proj(k, params["wk"], params["bk"]), Skv)
    V = split(proj(v, params["wv"], params["bv"]), Skv)
    scores = jnp.einsum("bhqd,bhkd->bhqk", Q, K) / math.sqrt(d_k)
    if mask is not None:
        scores = jnp.where(mask[:, None, :, :] == 0, -1e9, scores)
    probs = jax.nn.softmax(scores, axis=-1)
    attn = jnp.einsum("bhqk,bhkd->bhqd", probs, V)
    attn = attn.transpose(0, 2, 1, 3).reshape(B, Sq, D)
    return proj(attn, params["wo"], params["bo"])


if __name__ == "__main__":
    H = 4
    key = jax.random.PRNGKey(0)
    keys = jax.random.split(key, 8)

    # --- test 1: self-attention (fused-QKV path), lane-dense d_model --------
    B, S, D = 8, 64, 128                    # block_b=4 -> 256-row projections
    x = jax.random.normal(keys[0], (B, S, D), jnp.float32)
    params = init_params(keys[1], D)
    out = jax.block_until_ready(multi_head_attention(x, x, x, params, num_heads=H))
    ref = mha_reference(x, x, x, params, num_heads=H)
    assert out.shape == (B, S, D)
    err = float(jnp.max(jnp.abs(out - ref)))
    assert err < 5e-2, f"self-attention mismatch: max abs err {err}"

    # --- test 2: self-attention with a causal mask ---------------------------
    causal = jnp.broadcast_to(jnp.tril(jnp.ones((S, S), jnp.float32)), (B, S, S))
    out_m = jax.block_until_ready(
        multi_head_attention(x, x, x, params, num_heads=H, mask=causal))
    ref_m = mha_reference(x, x, x, params, num_heads=H, mask=causal)
    err_m = float(jnp.max(jnp.abs(out_m - ref_m)))
    assert err_m < 5e-2, f"masked self-attention mismatch: max abs err {err_m}"

    # --- test 3: cross-attention, S_kv != S_q (separate-projection path) -----
    Skv = 32
    q = jax.random.normal(keys[2], (B, S, D), jnp.float32)
    k = jax.random.normal(keys[3], (B, Skv, D), jnp.float32)
    v = jax.random.normal(keys[4], (B, Skv, D), jnp.float32)
    out2 = jax.block_until_ready(multi_head_attention(q, k, v, params, num_heads=H))
    ref2 = mha_reference(q, k, v, params, num_heads=H)
    err2 = float(jnp.max(jnp.abs(out2 - ref2)))
    assert err2 < 5e-2, f"cross-attention mismatch: max abs err {err2}"

    # --- test 4: original small / sub-128-lane shapes -------------------------
    Bs, Ss, Ds = 2, 8, 32
    params_s = init_params(keys[5], Ds)
    xs = jax.random.normal(keys[6], (Bs, Ss, Ds), jnp.float32)
    out3 = jax.block_until_ready(multi_head_attention(xs, xs, xs, params_s, num_heads=H))
    ref3 = mha_reference(xs, xs, xs, params_s, num_heads=H)
    err3 = float(jnp.max(jnp.abs(out3 - ref3)))
    assert err3 < 5e-2, f"small-shape mismatch: max abs err {err3}"

    print("KERNEL_OK")
</pallas_src>

<mosaic_0001>
module attributes {stable_mosaic.version = 11 : i64} {
  func.func @_mha_kernel(%arg0: i32, %arg1: i32, %arg2: memref<4x64x128xf32, #tpu.memory_space<vmem>>, %arg3: memref<1x128x96xbf16, #tpu.memory_space<vmem>>, %arg4: memref<1x1x96xf32, #tpu.memory_space<vmem>>, %arg5: memref<1x32x128xbf16, #tpu.memory_space<vmem>>, %arg6: memref<1x128xf32, #tpu.memory_space<vmem>>, %arg7: memref<4x64x128xf32, #tpu.memory_space<vmem>>, %arg8: memref<256x128xf32, #tpu.memory_space<vmem>>) attributes {dimension_semantics = [#tpu.dimension_semantics<parallel>, #tpu.dimension_semantics<arbitrary>], iteration_bounds = array<i64: 2, 4>, scalar_prefetch = 0 : i64, scratch_operands = 1 : i64, tpu.core_type = #tpu.core_type<tc>, window_params = [{transform_indices = @transform_0, window_bounds = array<i64: 4, 64, 128>}, {transform_indices = @transform_1, window_bounds = array<i64: 1, 128, 96>}, {transform_indices = @transform_2, window_bounds = array<i64: 1, 1, 96>}, {transform_indices = @transform_3, window_bounds = array<i64: 1, 32, 128>}, {pipeline_mode = #tpu.pipeline_mode<synchronous>, transform_indices = @transform_4, window_bounds = array<i64: 1, 128>}, {transform_indices = @transform_5, window_bounds = array<i64: 4, 64, 128>}]} {
    %c0 = arith.constant 0 : index
    %c0_0 = arith.constant 0 : index
    %c0_1 = arith.constant 0 : index
    %0 = vector.load %arg2[%c0, %c0_0, %c0_1] : memref<4x64x128xf32, #tpu.memory_space<vmem>>, vector<4x64x128xf32>
    %1 = vector.shape_cast %0 : vector<4x64x128xf32> to vector<256x128xf32>
    %2 = arith.truncf %1 : vector<256x128xf32> to vector<256x128xbf16>
    %c0_2 = arith.constant 0 : index
    %c0_3 = arith.constant 0 : index
    %c0_4 = arith.constant 0 : index
    %3 = vector.load %arg3[%c0_2, %c0_3, %c0_4] : memref<1x128x96xbf16, #tpu.memory_space<vmem>>, vector<1x128x96xbf16>
    %4 = vector.shape_cast %3 : vector<1x128x96xbf16> to vector<128x96xbf16>
    %cst = arith.constant dense<0.000000e+00> : vector<256x96xf32>
    %5 = tpu.matmul %2, %4, %cst {dimension_numbers = #tpu.dot_dimension_numbers<[1], [0], [0], [1], [0, 0, 1, 1], [], []>} : vector<256x128xbf16>, vector<128x96xbf16>, vector<256x96xf32> -> vector<256x96xf32>
    %c0_5 = arith.constant 0 : index
    %c0_6 = arith.constant 0 : index
    %c0_7 = arith.constant 0 : index
    %6 = vector.load %arg4[%c0_5, %c0_6, %c0_7] : memref<1x1x96xf32, #tpu.memory_space<vmem>>, vector<1x1x96xf32>
    %7 = vector.shape_cast %6 : vector<1x1x96xf32> to vector<1x96xf32>
    %8 = vector.broadcast %7 : vector<1x96xf32> to vector<256x96xf32>
    %9 = arith.addf %5, %8 : vector<256x96xf32>
    %10 = vector.extract_strided_slice %9 {offsets = [0, 0], sizes = [256, 32], strides = [1, 1]} : vector<256x96xf32> to vector<256x32xf32>
    %11 = vector.extract_strided_slice %9 {offsets = [0, 32], sizes = [256, 32], strides = [1, 1]} : vector<256x96xf32> to vector<256x32xf32>
    %12 = vector.extract_strided_slice %9 {offsets = [0, 64], sizes = [256, 32], strides = [1, 1]} : vector<256x96xf32> to vector<256x32xf32>
    %13 = vector.shape_cast %10 : vector<256x32xf32> to vector<4x64x32xf32>
    %14 = arith.truncf %13 : vector<4x64x32xf32> to vector<4x64x32xbf16>
    %15 = vector.shape_cast %11 : vector<256x32xf32> to vector<4x64x32xf32>
    %16 = arith.truncf %15 : vector<4x64x32xf32> to vector<4x64x32xbf16>
    %17 = vector.shape_cast %12 : vector<256x32xf32> to vector<4x64x32xf32>
    %18 = arith.truncf %17 : vector<4x64x32xf32> to vector<4x64x32xbf16>
    "tpu.trace_start"() <{level = 10 : i32, message = "bqd,bkd->bqk"}> : () -> ()
    %cst_8 = arith.constant dense<0.000000e+00> : vector<4x64x64xf32>
    %19 = tpu.matmul %14, %16, %cst_8 {dimension_numbers = #tpu.dot_dimension_numbers<[2], [2], [1], [1], [0, 0, 0, 1, 1, 1], [0], [0]>} : vector<4x64x32xbf16>, vector<4x64x32xbf16>, vector<4x64x64xf32> -> vector<4x64x64xf32>
    "tpu.trace_stop"() : () -> ()
    %cst_9 = arith.constant dense<0xFF800000> : vector<4x64xf32>
    %20 = vector.multi_reduction <maximumf>, %19, %cst_9 [2] : vector<4x64x64xf32> to vector<4x64xf32>
    %21 = vector.shape_cast %20 : vector<4x64xf32> to vector<4x64x1xf32>
    %22 = vector.broadcast %21 : vector<4x64x1xf32> to vector<4x64x64xf32>
    %23 = arith.subf %19, %22 : vector<4x64x64xf32>
    %24 = math.exp %23 : vector<4x64x64xf32>
    %cst_10 = arith.constant dense<0.000000e+00> : vector<4x64xf32>
    %25 = vector.multi_reduction <add>, %24, %cst_10 [2] : vector<4x64x64xf32> to vector<4x64xf32>
    %26 = vector.shape_cast %25 : vector<4x64xf32> to vector<4x64x1xf32>
    %27 = tpu.reciprocal %26 {approx = true} : vector<4x64x1xf32> -> vector<4x64x1xf32>
    %28 = vector.broadcast %27 : vector<4x64x1xf32> to vector<4x64x64xf32>
    %29 = arith.mulf %24, %28 : vector<4x64x64xf32>
    %30 = arith.truncf %29 : vector<4x64x64xf32> to vector<4x64x64xbf16>
    "tpu.trace_start"() <{level = 10 : i32, message = "bqk,bkd->bqd"}> : () -> ()
    %cst_11 = arith.constant dense<0.000000e+00> : vector<4x64x32xf32>
    %31 = tpu.matmul %30, %18, %cst_11 {dimension_numbers = #tpu.dot_dimension_numbers<[2], [1], [1], [2], [0, 0, 0, 1, 1, 2], [0], [0]>} : vector<4x64x64xbf16>, vector<4x64x32xbf16>, vector<4x64x32xf32> -> vector<4x64x32xf32>
    "tpu.trace_stop"() : () -> ()
    %32 = vector.shape_cast %31 : vector<4x64x32xf32> to vector<256x32xf32>
    %33 = arith.truncf %32 : vector<256x32xf32> to vector<256x32xbf16>
    %c0_12 = arith.constant 0 : index
    %c0_13 = arith.constant 0 : index
    %c0_14 = arith.constant 0 : index
    %34 = vector.load %arg5[%c0_12, %c0_13, %c0_14] : memref<1x32x128xbf16, #tpu.memory_space<vmem>>, vector<1x32x128xbf16>
    %35 = vector.shape_cast %34 : vector<1x32x128xbf16> to vector<32x128xbf16>
    %cst_15 = arith.constant dense<0.000000e+00> : vector<256x128xf32>
    %36 = tpu.matmul %33, %35, %cst_15 {dimension_numbers = #tpu.dot_dimension_numbers<[1], [0], [0], [1], [0, 0, 1, 1], [], []>} : vector<256x32xbf16>, vector<32x128xbf16>, vector<256x128xf32> -> vector<256x128xf32>
    %c0_i32 = arith.constant 0 : i32
    %37 = arith.cmpi eq, %arg1, %c0_i32 : i32
    %38 = arith.extui %37 : i1 to i32
    %c0_i32_16 = arith.constant 0 : i32
    %39 = arith.cmpi ne, %38, %c0_i32_16 : i32
    scf.if %39 {
      %c0_20 = arith.constant 0 : index
      %c0_21 = arith.constant 0 : index
      %46 = vector.load %arg6[%c0_20, %c0_21] : memref<1x128xf32, #tpu.memory_space<vmem>>, vector<1x128xf32>
      %47 = vector.broadcast %46 : vector<1x128xf32> to vector<256x128xf32>
      %48 = arith.addf %36, %47 : vector<256x128xf32>
      %c0_22 = arith.constant 0 : index
      %c0_23 = arith.constant 0 : index
      %49 = vector.load %arg8[%c0_22, %c0_23] : memref<256x128xf32, #tpu.memory_space<vmem>>, vector<256x128xf32>
      tpu.vector_store %arg8[%c0_22, %c0_23], %48 {strides = array<i32>} : memref<256x128xf32, #tpu.memory_space<vmem>>, vector<256x128xf32>,
    } else {
    }
    %c0_i32_17 = arith.constant 0 : i32
    %40 = arith.cmpi sgt, %arg1, %c0_i32_17 : i32
    %41 = arith.extui %40 : i1 to i32
    %c0_i32_18 = arith.constant 0 : i32
    %42 = arith.cmpi ne, %41, %c0_i32_18 : i32
    scf.if %42 {
      %c0_20 = arith.constant 0 : index
      %c0_21 = arith.constant 0 : index
      %46 = vector.load %arg8[%c0_20, %c0_21] : memref<256x128xf32, #tpu.memory_space<vmem>>, vector<256x128xf32>
      %47 = arith.addf %46, %36 : vector<256x128xf32>
      %c0_22 = arith.constant 0 : index
      %c0_23 = arith.constant 0 : index
      %48 = vector.load %arg8[%c0_22, %c0_23] : memref<256x128xf32, #tpu.memory_space<vmem>>, vector<256x128xf32>
      tpu.vector_store %arg8[%c0_22, %c0_23], %47 {strides = array<i32>} : memref<256x128xf32, #tpu.memory_space<vmem>>, vector<256x128xf32>,
    } else {
    }
    %c3_i32 = arith.constant 3 : i32
    %43 = arith.cmpi eq, %arg1, %c3_i32 : i32
    %44 = arith.extui %43 : i1 to i32
    %c0_i32_19 = arith.constant 0 : i32
    %45 = arith.cmpi ne, %44, %c0_i32_19 : i32
    scf.if %45 {
      %c0_20 = arith.constant 0 : index
      %c0_21 = arith.constant 0 : index
      %46 = vector.load %arg8[%c0_20, %c0_21] : memref<256x128xf32, #tpu.memory_space<vmem>>, vector<256x128xf32>
      %47 = vector.shape_cast %46 : vector<256x128xf32> to vector<4x64x128xf32>
      %c0_22 = arith.constant 0 : index
      %c0_23 = arith.constant 0 : index
      %c0_24 = arith.constant 0 : index
      %48 = vector.load %arg7[%c0_22, %c0_23, %c0_24] : memref<4x64x128xf32, #tpu.memory_space<vmem>>, vector<4x64x128xf32>
      tpu.vector_store %arg7[%c0_22, %c0_23, %c0_24], %47 {strides = array<i32>} : memref<4x64x128xf32, #tpu.memory_space<vmem>>, vector<4x64x128xf32>,
    } else {
    }
    return
  }
  func.func @transform_0(%arg0: i32, %arg1: i32) -> (i32, i32, i32) {
    %c0_i32 = arith.constant 0 : i32
    %c0_i32_0 = arith.constant 0 : i32
    %c0_i32_1 = arith.constant 0 : i32
    return %arg0, %c0_i32, %c0_i32_0 : i32, i32, i32
  }
  func.func @transform_1(%arg0: i32, %arg1: i32) -> (i32, i32, i32) {
    %c0_i32 = arith.constant 0 : i32
    %c0_i32_0 = arith.constant 0 : i32
    %c0_i32_1 = arith.constant 0 : i32
    return %arg1, %c0_i32, %c0_i32_0 : i32, i32, i32
  }
  func.func @transform_2(%arg0: i32, %arg1: i32) -> (i32, i32, i32) {
    %c0_i32 = arith.constant 0 : i32
    %c0_i32_0 = arith.constant 0 : i32
    %c0_i32_1 = arith.constant 0 : i32
    return %arg1, %c0_i32, %c0_i32_0 : i32, i32, i32
  }
  func.func @transform_3(%arg0: i32, %arg1: i32) -> (i32, i32, i32) {
    %c0_i32 = arith.constant 0 : i32
    %c0_i32_0 = arith.constant 0 : i32
    %c0_i32_1 = arith.constant 0 : i32
    return %arg1, %c0_i32, %c0_i32_0 : i32, i32, i32
  }
  func.func @transform_4(%arg0: i32, %arg1: i32) -> (i32, i32) {
    %c0_i32 = arith.constant 0 : i32
    %c0_i32_0 = arith.constant 0 : i32
    %c0_i32_1 = arith.constant 0 : i32
    return %c0_i32, %c0_i32_0 : i32, i32
  }
  func.func @transform_5(%arg0: i32, %arg1: i32) -> (i32, i32, i32) {
    %c0_i32 = arith.constant 0 : i32
    %c0_i32_0 = arith.constant 0 : i32
    %c0_i32_1 = arith.constant 0 : i32
    return %arg0, %c0_i32, %c0_i32_0 : i32, i32, i32
  }
}

</mosaic_0001>

<bundles_post_ra>
// kernel: tpu_custom_call.1
= control target key start
LH: loop header
LB: loop body
LE: loop exit
PB: predicated region body
PF: predicated region fallthrough
CT: control target
= control target key end

     0   :  { %10 = vsyncpa [#allocation4], 0  ;;  %s3510_s0 = inlined_call_operand.hbm [shape: f32[8,64,128], index: 0, kind: input, shape index: {}]   ;;  %s3511_s1 = inlined_call_operand.vmem [shape: bf16[4,128,96], index: 1, kind: input, shape index: {}]   ;;  %s3512_s2 = inlined_call_operand.vmem [shape: f32[4,1,96], index: 2, kind: input, shape index: {}]   ;;  %s3513_s3 = inlined_call_operand.vmem [shape: bf16[4,32,128], index: 3, kind: input, shape index: {}]   ;;  %s3514_s4 = inlined_call_operand.vmem [shape: f32[1,128], index: 4, kind: input, shape index: {}]   ;;  %s3515_s5 = inlined_call_operand.hbm [shape: f32[8,64,128], index: 5, kind: output, shape index: {}]  }
   0x1   :  { %12 = vsyncpa [#allocation4 + $0x1], 0 }
   0x2   :  { %13 = vsyncpa [#allocation5], 0 }
   0x3   :  { %15 = vsyncpa [#allocation5 + $0x1], 0  ;;  %s2605_s18 = smov 0   ;;  %s2607_s19 = smov 0  }
   0x4   :  { %s2609_s20 = smov 0   ;;  %s2611_s21 = smov 0  }
   0x5   :  { %s2613_s22 = smov 0   ;;  %s2615_s23 = smov 0  }
   0x6   :  { %s2617_s24 = smov 0   ;;  %s2619_s25 = smov 0  }
   0x7 LB: > { %3518 = sst [smem:[#allocation9_spill]] %s2559_s23  ;;  %s2097_s26 = sadd.s32 4294967295, %s2567_s25   ;;  %s2567_s25 = sphi %s2619_s25, %s21_s25   ;;  %s2563_s24 = sphi %s2617_s24, %s3532_s24   ;;  %s2559_s23 = sphi %s2615_s23, %s3526_s23   ;;  %s2555_s22 = sphi %s2613_s22, %s3531_s22   ;;  %s2551_s21 = sphi %s2611_s21, %s3525_s21   ;;  %s2547_s20 = sphi %s2609_s20, %s3530_s20   ;;  %s2543_s19 = sphi %s2607_s19, %s3529_s19   ;;  %s2539_s18 = sphi %s2605_s18, %s3528_s18  }
   0x8   : > { %s2098_s27 = sadd.s32 4294967294, %s2567_s25   ;;  %s30_s28 = sadd.s32 1, %s2559_s23 }
   0x9   : > { %s33_s29 = sadd.s32 1, %s2563_s24  ;;  %p31_p0 = scmp.ge.s32.totalorder %s30_s28, 4 }
   0xa   : > { %s40_s30 = sadd.s32 1, %s2547_s20  ;;  %p47_p1 = scmp.ne.s32.totalorder %s2547_s20, %s2543_s19 }
   0xb   : > { %p48_p2 = scmp.eq.s32.totalorder %s2567_s25, 0  ;;  %s3534_s28 = smov (%p31_p0, %s30_s28), 0 }
   0xc   : > { %3519 = sst [smem:[#allocation10_spill]] %s3534_s28  ;;  %s3536_s29 = smov (!%p31_p0, %s33_s29), %s2563_s24 }
   0xd   : > { %p2656_p3 = por %p48_p2, %p47_p1  ;;  %p53_p4 = scmp.ne.s32.totalorder %s2543_s19, %s2539_s18 }
   0xe   : > { %p35_p5 = scmp.ge.s32.totalorder %s3536_s29, 2  ;;  %p54_p6 = scmp.eq.s32.totalorder %s2097_s26, 0 }
   0xf   : > { %p176_p7 = scmp.eq.s32.totalorder %s2097_s26, 7  ;;  %p182_p8 = scmp.eq.s32.totalorder %s2098_s27, 7 }
  0x10   : > { %s3538_s29 = smov (%p35_p5, %s3536_s29), 0  ;;  %p2664_p9 = por %p54_p6, %p53_p4 }
  0x11   : > { %3521 = sst [smem:[#allocation11_spill]] %s3538_s29  ;;  %p2668_p10 = por %p176_p7, %p47_p1 }
  0x12   : > { %s37_s9 = ssub.s32 %s2563_s24, %s3538_s29  ;;  %p2674_p11 = por %p182_p8, %p53_p4 }
  0x13   : > { %p38_p12 = scmp.eq.s32.totalorder %s37_s9, 0  ;;  %p2237_p13 = scmp.lt.s32.totalorder %s2567_s25, 8 }
  0x14   : > { %s205_s11 = sand.u32 1, %s2547_s20   ;;  %s2210_s14 = sshll.u32 %s2563_s24, 8 }
  0x15   : > { %s2681_s12 = scalar_select %p38_p12, %s2547_s20, %s40_s30  }
  0x16   : > { %s2101_s13 = sshll.u32 %s205_s11, 8  ;;  %s215_s17 = scalar_lea.hbm %s3510_s0, %s2210_s14 }
  0x17   : > { %s209_s26 = scalar_lea.vmem [#allocation3], %s2101_s13  ;;  %s216_s28 = sshll.u32 %s215_s17, 4  ;;  %s217_s28 = int_to_ptr.hbm [resolvable:$true] %s216_s28 }
  0x18   : > { %s218_s27 = sshll.u32 %s209_s26, 4  ;;  %p2230_p0 = pnand %p2237_p13, %p2656_p3  ;;  %s219_s27 = int_to_ptr.vmem [resolvable:$true] %s218_s27 }
  0x19   : > { %p2105_p1 = scmp.ge.s32.totalorder %s2567_s25, 1  ;;  %s206_s9 = scalar_lea.sflag [#allocation4], %s205_s11 }
  0x1a   : > { %s2569_s29 = smov 128   ;;  %s2570_s23 = smov 8  }
  0x1b   : > { %2232 = dma.hbm_to_vmem [thread:$0]  (!%p2230_p0), %s217_s28, 4096, %s219_s27, %s206_s9, %s2569_s29, %s2569_s29, %s2570_s23  }
  0x1c   : > { %p248_p2 = scmp.lt.s32.totalorder %s2567_s25, 9 }
  0x1e   : > { %p249_p4 = pnand %p2105_p1, %p248_p2 }
  0x1f   : > { %s2692_s30 = sand.u32 (!%p249_p4), 1, %s2543_s19  }
  0x20   : > { %252 = sbr.rel (%p249_p4) target bundleno = 1573 (0x625), region = 40  ;;  %s2106_s13 = sshll.u32 (!%p249_p4), %s2692_s30, 8 }
  0x21   : > { %s255_s14 = scalar_lea.sflag (!%p249_p4), [#allocation4], %s2692_s30  ;;  %s2698_s6 = scalar_lea.vmem (!%p249_p4), [#allocation3], %s2106_s13 }
  0x25   : > { %2530 = dma.done.wait (%p2664_p9), %s255_s14, 4096  }
  0x26   : > { %2532 = vsyncadd (%p2664_p9), %s255_s14, 4294963200  ;;  %p300_p3 = scmp.lt.s32.totalorder %s2551_s21, 3  ;;  %v315_v8 = vld [vmem:[%s2698_s6] sm:$0xff]  ;;  %v316_v9 = vld [vmem:[%s2698_s6 + $0x8] sm:$0xff]  ;;  %s2571_s9 = smov 96   ;;  %vm580_vm0 = vcmask 261120  }
  0x27   : > { %v347_v10 = vpack.c.bf16 %v316_v9, %v315_v8  ;;  %v317_v11 = vld [vmem:[%s2698_s6 + $0x10] sm:$0xff]  ;;  %v318_v12 = vld [vmem:[%s2698_s6 + $0x18] sm:$0xff]  ;;  %v319_v14 = vld [vmem:[%s2698_s6 + $0x20] sm:$0xff]  ;;  %s2572_s14 = smov 64   ;;  %vm877_vm1 = vcmask 523264   ;;  %p2200_p5 = scmp.ne.s32.totalorder %s2551_s21, 0 }
  0x28   : > { %s2706_s23 = scalar_select %p300_p3, %s2551_s21, 3  ;;  %v348_v13 = vpack.c.bf16 %v318_v12, %v317_v11  ;;  %v320_v15 = vld [vmem:[%s2698_s6 + $0x28] sm:$0xff]  ;;  %v321_v17 = vld [vmem:[%s2698_s6 + $0x30] sm:$0xff]  ;;  %v322_v18 = vld [vmem:[%s2698_s6 + $0x38] sm:$0xff] }
  0x29   : > { %v349_v16 = vpack.c.bf16 %v320_v15, %v319_v14  ;;  %v350_v19 = vpack.c.bf16 %v322_v18, %v321_v17  ;;  %v323_v20 = vld [vmem:[%s2698_s6 + $0x40] sm:$0xff]  ;;  %v324_v21 = vld [vmem:[%s2698_s6 + $0x48] sm:$0xff]  ;;  %v325_v23 = vld [vmem:[%s2698_s6 + $0x50] sm:$0xff] }
  0x2a   : > { %s2211_s28 = sshll.u32 %s2706_s23, 6  ;;  %s307_s26 = scalar_lea.vmem %s3512_s2, %s2706_s23  ;;  %v351_v22 = vpack.c.bf16 %v324_v21, %v323_v20  ;;  %v326_v24 = vld [vmem:[%s2698_s6 + $0x58] sm:$0xff]  ;;  %v327_v26 = vld [vmem:[%s2698_s6 + $0x60] sm:$0xff]  ;;  %v328_v27 = vld [vmem:[%s2698_s6 + $0x68] sm:$0xff] }
  0x2b   : > { %s304_s15 = scalar_lea.vmem %s3511_s1, %s2211_s28  ;;  %v352_v25 = vpack.c.bf16 %v326_v24, %v325_v23  ;;  %v353_v28 = vpack.c.bf16 %v328_v27, %v327_v26  ;;  %v329_v29 = vld [vmem:[%s2698_s6 + $0x70] sm:$0xff]  ;;  %v330_v30 = vld [vmem:[%s2698_s6 + $0x78] sm:$0xff]  ;;  %v331_v32 = vld [vmem:[%s2698_s6 + $0x80] sm:$0xff] }
  0x2c   : > { %v2220_v0 = vld [vmem:[%s304_s15 + $0x38] sm:$0xff]  ;;  %v2219_v1 = vld [vmem:[%s304_s15 + $0x30] sm:$0xff]  ;;  %v2218_v2 = vld [vmem:[%s304_s15 + $0x28] sm:$0xff]  ;;  %v354_v31 = vpack.c.bf16 %v330_v30, %v329_v29 }
  0x2d   : > { %431 = vmatpush.bf16.msra.mxu0 %v2220_v0  ;;  %v2217_v3 = vld [vmem:[%s304_s15 + $0x20] sm:$0xff]  ;;  %v2216_v4 = vld [vmem:[%s304_s15 + $0x18] sm:$0xff]  ;;  %v2215_v5 = vld [vmem:[%s304_s15 + $0x10] sm:$0xff] }
  0x2e   : > { %v2214_v6 = vld [vmem:[%s304_s15 + $0x8] sm:$0xff]  ;;  %v2213_v7 = vld [vmem:[%s304_s15] sm:$0xff]  ;;  %v333_v37 = vld [vmem:[%s2698_s6 + $0x90] sm:$0xff] }
  0x2f   : > { %v332_v33 = vld [vmem:[%s2698_s6 + $0x88] sm:$0xff]  ;;  %v334_v38 = vld [vmem:[%s2698_s6 + $0x98] sm:$0xff]  ;;  %v2741_v41 = vld [vmem:[%s307_s26] ss:$0 sm:$0xff] }
  0x30   : > { %v355_v34 = vpack.c.bf16 %v332_v33, %v331_v32  ;;  %v356_v39 = vpack.c.bf16 %v334_v38, %v333_v37  ;;  %v335_v48 = vld [vmem:[%s2698_s6 + $0xa0] sm:$0xff]  ;;  %v336_v49 = vld [vmem:[%s2698_s6 + $0xa8] sm:$0xff]  ;;  %v337_v62 = vld [vmem:[%s2698_s6 + $0xb0] sm:$0xff] }
  0x31   : > { %432 = vmatpush.bf16.msra.mxu0 %v2219_v1  ;;  %v357_v55 = vpack.c.bf16 %v336_v49, %v335_v48  ;;  %v338_v63 = vld [vmem:[%s2698_s6 + $0xb8] sm:$0xff]  ;;  %v339_v8 = vld [vmem:[%s2698_s6 + $0xc0] sm:$0xff]  ;;  %v340_v9 = vld [vmem:[%s2698_s6 + $0xc8] sm:$0xff] }
  0x32   : > { %v358_v0 = vpack.c.bf16 %v338_v63, %v337_v62  ;;  %v359_v15 = vpack.c.bf16 %v340_v9, %v339_v8  ;;  %v341_v27 = vld [vmem:[%s2698_s6 + $0xd0] sm:$0xff]  ;;  %v346_v48 = vld [vmem:[%s2698_s6 + $0xf8] sm:$0xff] }
  0x35   : > { %433 = vmatpush.bf16.msra.mxu0 %v2218_v2 }
  0x39   : > { %434 = vmatpush.bf16.msra.mxu0 %v2217_v3 }
  0x3d   : > { %435 = vmatpush.bf16.msra.mxu0 %v2216_v4 }
  0x41   : > { %436 = vmatpush.bf16.msra.mxu0 %v2215_v5 }
  0x45   : > { %437 = vmatpush.bf16.msra.mxu0 %v2214_v6 }
  0x49   : > { %438 = vmatpush.bf16.msra.mxu0 %v2213_v7 }
  0x4c   : > { %439 = vmatmul.bf16.vlgmr.msra.gmra.mxu0 %v347_v10 }
  0x5c   : > { %444 = vmatmul.bf16.gmra.mxu0 %v348_v13 }
  0x6c   : > { %449 = vmatmul.bf16.gmra.mxu0 %v349_v16 }
  0x7c   : > { %454 = vmatmul.bf16.gmra.mxu0 %v350_v19 }
  0x8c   : > { %459 = vmatmul.bf16.gmra.mxu0 %v351_v22 }
  0x9c   : > { %464 = vmatmul.bf16.gmra.mxu0 %v352_v25 }
  0xac   : > { %469 = vmatmul.bf16.gmra.mxu0 %v353_v28  ;;  %v342_v28 = vld [vmem:[%s2698_s6 + $0xd8] sm:$0xff] }
  0xbc   : > { %474 = vmatmul.bf16.gmra.mxu0 %v354_v31  ;;  %v360_v31 = vpack.c.bf16 %v342_v28, %v341_v27 }
  0xc9   : > { %v440_v35 = vpop.f32.mrf.mxu0 }
  0xca   : > { %v441_v50 = vadd.f32 %v2741_v41, %v440_v35 }
  0xcc   : > { %479 = vmatmul.bf16.gmra.mxu0 %v355_v34  ;;  %v520_v57 = vpack.c.bf16 %v441_v50, %v441_v50 }
  0xce   : > { %v560_v59 = vunpack.c.l.b16 %v520_v57 }
  0xd1   : > { %v442_v36 = vpop.f32.mrf.mxu0 }
  0xd2   : > { %v443_v46 = vadd.f32 %v2741_v41, %v442_v36 }
  0xd4   : > { %v521_v53 = vpack.c.bf16 %v443_v46, %v443_v46 }
  0xd6   : > { %v561_v58 = vunpack.c.l.b16 %v521_v53 }
  0xd8   : > { %v2753_v60 = vpack.c.b16 %v561_v58, %v560_v59 }
  0xd9   : > { %v445_v40 = vpop.f32.mrf.mxu0 }
  0xda   : > { %v446_v42 = vadd.f32 %v2741_v41, %v445_v40  ;;  %v344_v40 = vld [vmem:[%s2698_s6 + $0xe8] sm:$0xff] }
  0xdc   : > { %484 = vmatmul.bf16.gmra.mxu0 %v356_v39  ;;  %v522_v44 = vpack.c.bf16 %v446_v42, %v446_v42  ;;  %v343_v39 = vld [vmem:[%s2698_s6 + $0xe0] sm:$0xff] }
  0xde   : > { %v562_v51 = vunpack.c.l.b16 %v522_v44  ;;  %v361_v44 = vpack.c.bf16 %v344_v40, %v343_v39 }
  0xe1   : > { %v447_v43 = vpop.f32.mrf.mxu0 }
  0xe2   : > { %v448_v45 = vadd.f32 %v2741_v41, %v447_v43 }
  0xe4   : > { %v523_v47 = vpack.c.bf16 %v448_v45, %v448_v45 }
  0xe6   : > { %v563_v52 = vunpack.c.l.b16 %v523_v47  ;;  %v345_v47 = vld [vmem:[%s2698_s6 + $0xf0] sm:$0xff]  ;;  %s2212_s6 = sshll.u32 %s2706_s23, 4  ;;  %s3362_s23 = scalar_lea.vmem [#allocation6], %s2106_s13 }
  0xe7   : > { %v362_v49 = vpack.c.bf16 %v346_v48, %v345_v47  ;;  %s312_s11 = scalar_lea.vmem %s3513_s3, %s2212_s6 }
  0xe8   : > { %v2749_v54 = vpack.c.b16 %v563_v52, %v562_v51 }
  0xe9   : > { %v450_v56 = vpop.f32.mrf.mxu0 }
  0xea   : > { %574 = vrot.lane.b32.xlu1 %v2749_v54, %s2571_s9  ;;  %v451_v10 = vadd.f32 %v2741_v41, %v450_v56 }
  0xec   : > { %489 = vmatmul.bf16.gmra.mxu0 %v357_v55  ;;  %v524_v17 = vpack.c.bf16 %v451_v10, %v451_v10 }
  0xee   : > { %v564_v20 = vunpack.c.l.b16 %v524_v17 }
  0xf1   : > { %v452_v61 = vpop.f32.mrf.mxu0 }
  0xf2   : > { %572 = vrot.lane.b32.xlu1 %v2753_v60, %s2571_s9  ;;  %v453_v6 = vadd.f32 %v2741_v41, %v452_v61 }
  0xf4   : > { %v525_v13 = vpack.c.bf16 %v453_v6, %v453_v6 }
  0xf6   : > { %v565_v18 = vunpack.c.l.b16 %v525_v13 }
  0xf8   : > { %v2770_v22 = vpack.c.b16 %v565_v18, %v564_v20 }
  0xf9   : > { %v455_v1 = vpop.f32.mrf.mxu0 }
  0xfa   : > { %v456_v2 = vadd.f32 %v2741_v41, %v455_v1 }
  0xfc   : > { %494 = vmatmul.bf16.gmra.mxu0 %v358_v0  ;;  %v526_v4 = vpack.c.bf16 %v456_v2, %v456_v2 }
  0xfe   : > { %v566_v11 = vunpack.c.l.b16 %v526_v4 }
 0x101   : > { %v457_v3 = vpop.f32.mrf.mxu0 }
 0x102   : > { %v458_v5 = vadd.f32 %v2741_v41, %v457_v3 }
 0x104   : > { %v527_v7 = vpack.c.bf16 %v458_v5, %v458_v5 }
 0x106   : > { %v567_v12 = vunpack.c.l.b16 %v527_v7 }
 0x108   : > { %v2765_v14 = vpack.c.b16 %v567_v12, %v566_v11 }
 0x109   : > { %v460_v16 = vpop.f32.mrf.mxu0 }
 0x10a   : > { %578 = vrot.lane.b32.xlu0 %v2765_v14, %s2571_s9  ;;  %v461_v19 = vadd.f32 %v2741_v41, %v460_v16 }
 0x10c   : > { %499 = vmatmul.bf16.gmra.mxu0 %v359_v15  ;;  %v528_v21 = vpack.c.bf16 %v461_v19, %v461_v19 }
 0x10e   : > { %v642_v25 = vunpack.c.l.b16 %v528_v21 }
 0x111   : > { %v462_v23 = vpop.f32.mrf.mxu0 }
 0x112   : > { %v463_v24 = vadd.f32 %v2741_v41, %v462_v23  ;;  %576 = vrot.lane.b32.xlu0 %v2770_v22, %s2571_s9 }
 0x114   : > { %v529_v26 = vpack.c.bf16 %v463_v24, %v463_v24 }
 0x116   : > { %v643_v29 = vunpack.c.l.b16 %v529_v26 }
 0x118   : > { %v2777_v30 = vpack.c.b16 %v643_v29, %v642_v25 }
 0x119   : > { %v465_v32 = vpop.f32.mrf.mxu0 }
 0x11a   : > { %654 = vrot.lane.b32.xlu1 %v2777_v30, %s2571_s9  ;;  %v466_v33 = vadd.f32 %v2741_v41, %v465_v32 }
 0x11c   : > { %504 = vmatmul.bf16.gmra.mxu0 %v360_v31  ;;  %v530_v34 = vpack.c.bf16 %v466_v33, %v466_v33 }
 0x11e   : > { %v644_v37 = vunpack.c.l.b16 %v530_v34 }
 0x121   : > { %v467_v35 = vpop.f32.mrf.mxu0 }
 0x122   : > { %v468_v36 = vadd.f32 %v2741_v41, %v467_v35 }
 0x124   : > { %v531_v38 = vpack.c.bf16 %v468_v36, %v468_v36 }
 0x126   : > { %v645_v42 = vunpack.c.l.b16 %v531_v38 }
 0x128   : > { %v2785_v43 = vpack.c.b16 %v645_v42, %v644_v37 }
 0x129   : > { %v470_v45 = vpop.f32.mrf.mxu0 }
 0x12a   : > { %656 = vrot.lane.b32.xlu0 %v2785_v43, %s2571_s9  ;;  %v471_v55 = vadd.f32 %v2741_v41, %v470_v45 }
 0x12c   : > { %509 = vmatmul.bf16.gmra.mxu0 %v361_v44  ;;  %v532_v61 = vpack.c.bf16 %v471_v55, %v471_v55 }
 0x12e   : > { %v646_v2 = vunpack.c.l.b16 %v532_v61 }
 0x131   : > { %v472_v46 = vpop.f32.mrf.mxu0 }
 0x132   : > { %v473_v56 = vadd.f32 %v2741_v41, %v472_v46 }
 0x134   : > { %v533_v62 = vpack.c.bf16 %v473_v56, %v473_v56 }
 0x136   : > { %v647_v3 = vunpack.c.l.b16 %v533_v62 }
 0x138   : > { %v2800_v5 = vpack.c.b16 %v647_v3, %v646_v2 }
 0x139   : > { %v475_v50 = vpop.f32.mrf.mxu0 }
 0x13a   : > { %v476_v51 = vadd.f32 %v2741_v41, %v475_v50 }
 0x13c   : > { %514 = vmatmul.bf16.gmra.mxu0 %v362_v49  ;;  %v534_v52 = vpack.c.bf16 %v476_v51, %v476_v51 }
 0x13e   : > { %v648_v58 = vunpack.c.l.b16 %v534_v52 }
 0x141   : > { %v477_v53 = vpop.f32.mrf.mxu0 }
 0x142   : > { %v478_v57 = vadd.f32 %v2741_v41, %v477_v53 }
 0x144   : > { %v535_v59 = vpack.c.bf16 %v478_v57, %v478_v57 }
 0x146   : > { %v649_v63 = vunpack.c.l.b16 %v535_v59 }
 0x148   : > { %v2795_v0 = vpack.c.b16 %v649_v63, %v648_v58 }
 0x149   : > { %v480_v1 = vpop.f32.mrf.mxu0 }
 0x14a   : > { %660 = vrot.lane.b32.xlu2 %v2795_v0, %s2571_s9  ;;  %v481_v4 = vadd.f32 %v2741_v41, %v480_v1 }
 0x14c   : > { %v536_v6 = vpack.c.bf16 %v481_v4, %v481_v4 }
 0x14e   : > { %v723_v9 = vunpack.c.l.b16 %v536_v6 }
 0x151   : > { %v482_v7 = vpop.f32.mrf.mxu0 }
 0x152   : > { %v483_v8 = vadd.f32 %v2741_v41, %v482_v7  ;;  %658 = vrot.lane.b32.xlu2 %v2800_v5, %s2571_s9 }
 0x154   : > { %v537_v10 = vpack.c.bf16 %v483_v8, %v483_v8 }
 0x156   : > { %v724_v11 = vunpack.c.l.b16 %v537_v10 }
 0x158   : > { %v2805_v12 = vpack.c.b16 %v724_v11, %v723_v9 }
 0x159   : > { %v485_v13 = vpop.f32.mrf.mxu0 }
 0x15a   : > { %735 = vrot.lane.b32.xlu2 %v2805_v12, %s2571_s9  ;;  %v486_v15 = vadd.f32 %v2741_v41, %v485_v13 }
 0x15c   : > { %v538_v16 = vpack.c.bf16 %v486_v15, %v486_v15  ;;  %v575_v48 = vpop.permute.xlu1 %574 }
 0x15d   : > { %v597_v52 = vsel %vm580_vm0, %v575_v48, 0 }
 0x15e   : > { %v725_v19 = vunpack.c.l.b16 %v538_v16 }
 0x161   : > { %v487_v17 = vpop.f32.mrf.mxu0 }
 0x162   : > { %v488_v18 = vadd.f32 %v2741_v41, %v487_v17  ;;  %1286 = vrot.lane.b32.xlu2 %v2770_v22, %s2572_s14 }
 0x164   : > { %v539_v20 = vpack.c.bf16 %v488_v18, %v488_v18  ;;  %v573_v56 = vpop.permute.xlu1 %572 }
 0x165   : > { %v594_v61 = vsel %vm580_vm0, %v573_v56, 0 }
 0x166   : > { %v726_v21 = vunpack.c.l.b16 %v539_v20 }
 0x168   : > { %v2813_v23 = vpack.c.b16 %v726_v21, %v725_v19 }
 0x169   : > { %v490_v24 = vpop.f32.mrf.mxu0 }
 0x16a   : > { %1282 = vrot.lane.b32.xlu2 %v2753_v60, %s2572_s14  ;;  %737 = vrot.lane.b32.xlu1 %v2813_v23, %s2571_s9  ;;  %v491_v25 = vadd.f32 %v2741_v41, %v490_v24 }
 0x16c   : > { %v540_v26 = vpack.c.bf16 %v491_v25, %v491_v25 }
 0x16e   : > { %v727_v29 = vunpack.c.l.b16 %v540_v26 }
 0x171   : > { %v492_v27 = vpop.f32.mrf.mxu0 }
 0x172   : > { %v493_v28 = vadd.f32 %v2741_v41, %v492_v27  ;;  %1361 = vrot.lane.b32.xlu2 %v2795_v0, %s2572_s14  ;;  %1288 = vrot.lane.b32.xlu1 %v2765_v14, %s2572_s14 }
 0x174   : > { %v541_v31 = vpack.c.bf16 %v493_v28, %v493_v28 }
 0x176   : > { %v728_v32 = vunpack.c.l.b16 %v541_v31 }
 0x178   : > { %v2825_v33 = vpack.c.b16 %v728_v32, %v727_v29 }
 0x179   : > { %v495_v34 = vpop.f32.mrf.mxu0 }
 0x17a   : > { %739 = vrot.lane.b32.xlu0 %v2825_v33, %s2571_s9  ;;  %1359 = vrot.lane.b32.xlu1 %v2800_v5, %s2572_s14  ;;  %v496_v35 = vadd.f32 %v2741_v41, %v495_v34 }
 0x17c   : > { %v579_v36 = vpop.permute.xlu0 %578  ;;  %v542_v38 = vpack.c.bf16 %v496_v35, %v496_v35 }
 0x17d   : > { %v603_v37 = vsel %vm580_vm0, %v579_v36, 0 }
 0x17e   : > { %609 = vmatpush.bf16.xpose.msra.mxu1 %v603_v37  ;;  %v729_v42 = vunpack.c.l.b16 %v542_v38 }
 0x181   : > { %v497_v39 = vpop.f32.mrf.mxu0 }
 0x182   : > { %v498_v40 = vadd.f32 %v2741_v41, %v497_v39  ;;  %1284 = vrot.lane.b32.xlu0 %v2749_v54, %s2572_s14 }
 0x184   : > { %v543_v44 = vpack.c.bf16 %v498_v40, %v498_v40  ;;  %v577_v45 = vpop.permute.xlu0 %576 }
 0x185   : > { %v600_v46 = vsel %vm580_vm0, %v577_v45, 0 }
 0x186   : > { %v730_v47 = vunpack.c.l.b16 %v543_v44  ;;  %610 = vmatpush.bf16.xpose.msra.mxu1 %v600_v46 }
 0x188   : > { %v2837_v49 = vpack.c.b16 %v730_v47, %v729_v42 }
 0x189   : > { %v500_v50 = vpop.f32.mrf.mxu0 }
 0x18a   : > { %1357 = vrot.lane.b32.xlu0 %v2785_v43, %s2572_s14  ;;  %741 = vrot.lane.b32.xlu2 %v2837_v49, %s2571_s9  ;;  %v501_v51 = vadd.f32 %v2741_v41, %v500_v50 }
 0x18b   : > { %1434 = vrot.lane.b32.xlu1 %v2837_v49, %s2572_s14 }
 0x18c   : > { %v544_v53 = vpack.c.bf16 %v501_v51, %v501_v51  ;;  %v655_v31 = vpop.permute.xlu1 %654 }
 0x18d   : > { %v675_v32 = vsel %vm580_vm0, %v655_v31, 0 }
 0x18e   : > { %611 = vmatpush.bf16.xpose.msra.mxu1 %v597_v52  ;;  %v804_v58 = vunpack.c.l.b16 %v544_v53 }
 0x191   : > { %v502_v55 = vpop.f32.mrf.mxu0 }
 0x192   : > { %v503_v57 = vadd.f32 %v2741_v41, %v502_v55  ;;  %1355 = vrot.lane.b32.xlu2 %v2777_v30, %s2572_s14 }
 0x194   : > { %v545_v59 = vpack.c.bf16 %v503_v57, %v503_v57 }
 0x196   : > { %v805_v62 = vunpack.c.l.b16 %v545_v59  ;;  %612 = vmatpush.bf16.xpose.msra.mxu1 %v594_v61 }
 0x198   : > { %v2851_v63 = vpack.c.b16 %v805_v62, %v804_v58 }
 0x199   : > { %v505_v1 = vpop.f32.mrf.mxu0 }
 0x19a   : > { %816 = vrot.lane.b32.xlu1 %v2851_v63, %s2571_s9  ;;  %v506_v2 = vadd.f32 %v2741_v41, %v505_v1 }
 0x19c   : > { %v546_v3 = vpack.c.bf16 %v506_v2, %v506_v2  ;;  %v657_v18 = vpop.permute.xlu0 %656 }
 0x19d   : > { %2144 = vmatmul.msk.bf16.vlgmr.msra.gmra.mxu1 %vm580_vm0, %v2753_v60  ;;  %v678_v24 = vsel %vm580_vm0, %v657_v18, 0 }
 0x19e   : > { %v806_v7 = vunpack.c.l.b16 %v546_v3 }
 0x1a1   : > { %v507_v4 = vpop.f32.mrf.mxu0 }
 0x1a2   : > { %v508_v6 = vadd.f32 %v2741_v41, %v507_v4 }
 0x1a4   : > { %v547_v8 = vpack.c.bf16 %v508_v6, %v508_v6  ;;  %v661_v9 = vpop.permute.xlu2 %660 }
 0x1a5   : > { %v684_v10 = vsel %vm580_vm0, %v661_v9, 0 }
 0x1a6   : > { %v807_v11 = vunpack.c.l.b16 %v547_v8  ;;  %690 = vmatpush.bf16.xpose.msra.mxu2 %v684_v10 }
 0x1a8   : > { %v2860_v13 = vpack.c.b16 %v807_v11, %v806_v7 }
 0x1a9   : > { %v510_v15 = vpop.f32.mrf.mxu0 }
 0x1aa   : > { %818 = vrot.lane.b32.xlu1 %v2860_v13, %s2571_s9  ;;  %v511_v16 = vadd.f32 %v2741_v41, %v510_v15 }
 0x1ac   : > { %v659_v60 = vpop.permute.xlu2 %658  ;;  %v548_v19 = vpack.c.bf16 %v511_v16, %v511_v16 }
 0x1ad   : > { %2145 = vmatmul.msk.bf16.gmra.mxu1 %vm580_vm0, %v2749_v54  ;;  %v681_v17 = vsel %vm580_vm0, %v659_v60, 0 }
 0x1ae   : > { %691 = vmatpush.bf16.xpose.msra.mxu2 %v681_v17  ;;  %v808_v25 = vunpack.c.l.b16 %v548_v19 }
 0x1b1   : > { %v512_v20 = vpop.f32.mrf.mxu0 }
 0x1b2   : > { %v513_v21 = vadd.f32 %v2741_v41, %v512_v20 }
 0x1b4   : > { %v549_v26 = vpack.c.bf16 %v513_v21, %v513_v21  ;;  %v736_v34 = vpop.permute.xlu2 %735 }
 0x1b6   : > { %v809_v27 = vunpack.c.l.b16 %v549_v26  ;;  %692 = vmatpush.bf16.xpose.msra.mxu2 %v678_v24 }
 0x1b8   : > { %v2870_v28 = vpack.c.b16 %v809_v27, %v808_v25 }
 0x1b9   : > { %v515_v29 = vpop.f32.mrf.mxu0 }
 0x1ba   : > { %820 = vrot.lane.b32.xlu1 %v2870_v28, %s2571_s9  ;;  %v516_v54 = vadd.f32 %v2741_v41, %v515_v29 }
 0x1bc   : > { %v550_v35 = vpack.c.bf16 %v516_v54, %v516_v54  ;;  %v1287_v42 = vpop.permute.xlu2 %1286 }
 0x1bd   : > { %2146 = vmatmul.msk.bf16.gmra.mxu1 %vm580_vm0, %v2770_v22 }
 0x1be   : > { %693 = vmatpush.bf16.xpose.msra.mxu2 %v675_v32  ;;  %v810_v38 = vunpack.c.l.b16 %v550_v35 }
 0x1c1   : > { %v517_v36 = vpop.f32.mrf.mxu0 }
 0x1c2   : > { %v518_v37 = vadd.f32 %v2741_v41, %v517_v36 }
 0x1c4   : > { %v551_v39 = vpack.c.bf16 %v518_v37, %v518_v37  ;;  %v1283_v22 = vpop.permute.xlu2 %1282 }
 0x1c5   : > { %2148 = vmatmul.msk.bf16.vlgmr.msra.gmra.mxu2 %vm580_vm0, %v2777_v30 }
 0x1c6   : > { %v811_v40 = vunpack.c.l.b16 %v551_v39 }
 0x1c8   : > { %v2881_v44 = vpack.c.b16 %v811_v40, %v810_v38 }
 0x1ca   : > { %822 = vrot.lane.b32.xlu0 %v2881_v44, %s2571_s9 }
 0x1cc   : > { %v1362_v41 = vpop.permute.xlu2 %1361 }
 0x1cd   : > { %2147 = vmatmul.msk.bf16.gmra.mxu1 %vm580_vm0, %v2765_v14 }
 0x1d5   : > { %2149 = vmatmul.msk.bf16.gmra.mxu2 %vm580_vm0, %v2785_v43  ;;  %v756_v43 = vsel %vm580_vm0, %v736_v34, 0 }
 0x1dc   : > { %v738_v45 = vpop.permute.xlu1 %737 }
 0x1dd   : > { %v759_v14 = vsel %vm580_vm0, %v738_v45, 0 }
 0x1e4   : > { %v742_v46 = vpop.permute.xlu2 %741  ;;  %v1289_v47 = vpop.permute.xlu1 %1288 }
 0x1e5   : > { %2150 = vmatmul.msk.bf16.gmra.mxu2 %vm580_vm0, %v2800_v5  ;;  %v765_v30 = vsel %vm580_vm0, %v742_v46, 0 }
 0x1e6   : > { %1310 = vmatpush.bf16.msrb.mxu2 %v1289_v47  ;;  %771 = vmatpush.bf16.xpose.msrb.mxu1 %v765_v30 }
 0x1ea   : > { %1311 = vmatpush.bf16.msrb.mxu2 %v1287_v42 }
 0x1ec   : > { %v740_v48 = vpop.permute.xlu0 %739  ;;  %v1360_v5 = vpop.permute.xlu1 %1359 }
 0x1ed   : > { %v762_v50 = vsel %vm580_vm0, %v740_v48, 0  ;;  %v1356_v53 = vpop.permute.xlu2 %1355 }
 0x1ee   : > { %772 = vmatpush.bf16.xpose.msrb.mxu1 %v762_v50 }
 0x1f4   : > { %v1285_v51 = vpop.permute.xlu0 %1284 }
 0x1f5   : > { %2151 = vmatmul.msk.bf16.gmra.mxu2 %vm580_vm0, %v2795_v0 }
 0x1f6   : > { %1312 = vmatpush.bf16.msrb.mxu2 %v1285_v51  ;;  %773 = vmatpush.bf16.xpose.msrb.mxu1 %v759_v14 }
 0x1fa   : > { %1313 = vmatpush.bf16.msrb.mxu2 %v1283_v22 }
 0x1fc   : > { %v1358_v52 = vpop.permute.xlu0 %1357 }
 0x1fd   : > { %v1435_v58 = vpop.permute.xlu1 %1434 }
 0x1fe   : > { %1383 = vmatpush.bf16.msra.mxu2 %v1362_v41  ;;  %774 = vmatpush.bf16.xpose.msrb.mxu1 %v756_v43 }
 0x202   : > { %1384 = vmatpush.bf16.msra.mxu2 %v1360_v5 }
 0x205   : > { %2152 = vmatmul.msk.bf16.vlgmr.msrb.gmra.mxu1 %vm580_vm0, %v2805_v12 }
 0x206   : > { %1385 = vmatpush.bf16.msra.mxu2 %v1358_v52 }
 0x20a   : > { %1386 = vmatpush.bf16.msra.mxu2 %v1356_v53 }
 0x20c   : > { %v817_v62 = vpop.permute.xlu1 %816 }
 0x20d   : > { %v837_v20 = vsel %vm580_vm0, %v817_v62, 0 }
 0x215   : > { %2153 = vmatmul.msk.bf16.gmra.mxu1 %vm580_vm0, %v2813_v23 }
 0x21a   : > { %v2901_v0 = vpop.f32.mrf.mxu1 }
 0x21b   : > { %v878_v55 = vsel %vm877_vm1, %v2901_v0, -inf }
 0x21c   : > { %879 = vmax.xlane.f32.xlu2 %v878_v55  ;;  %v819_v3 = vpop.permute.xlu1 %818 }
 0x21d   : > { %v840_v60 = vsel %vm580_vm0, %v819_v3, 0 }
 0x222   : > { %v2905_v56 = vpop.f32.mrf.mxu1 }
 0x223   : > { %v881_v57 = vsel %vm877_vm1, %v2905_v56, -inf }
 0x224   : > { %882 = vmax.xlane.f32.xlu0 %v881_v57 }
 0x225   : > { %2154 = vmatmul.msk.bf16.gmra.mxu1 %vm580_vm0, %v2825_v33 }
 0x22a   : > { %v2911_v59 = vpop.f32.mrf.mxu1 }
 0x22b   : > { %v884_v61 = vsel %vm877_vm1, %v2911_v59, -inf }
 0x22c   : > { %885 = vmax.xlane.f32.xlu1 %v884_v61  ;;  %v821_v8 = vpop.permute.xlu1 %820 }
 0x22d   : > { %v843_v10 = vsel %vm580_vm0, %v821_v8, 0 }
 0x232   : > { %v2915_v1 = vpop.f32.mrf.mxu1 }
 0x233   : > { %v887_v2 = vsel %vm877_vm1, %v2915_v1, -inf }
 0x234   : > { %888 = vmax.xlane.f32.xlu2 %v887_v2 }
 0x235   : > { %2155 = vmatmul.msk.bf16.gmra.mxu1 %vm580_vm0, %v2837_v49 }
 0x23a   : > { %v2921_v4 = vpop.f32.mrf.mxu1 }
 0x23b   : > { %v890_v32 = vsel %vm877_vm1, %v2921_v4, -inf }
 0x23c   : > { %v823_v6 = vpop.permute.xlu0 %822 }
 0x23d   : > { %v846_v7 = vsel %vm580_vm0, %v823_v6, 0 }
 0x23e   : > { %852 = vmatpush.bf16.xpose.msra.mxu1 %v846_v7 }
 0x242   : > { %v2924_v9 = vpop.f32.mrf.mxu1 }
 0x243   : > { %v893_v11 = vsel %vm877_vm1, %v2924_v9, -inf }
 0x244   : > { %894 = vmax.xlane.f32.xlu0 %v893_v11 }
 0x246   : > { %853 = vmatpush.bf16.xpose.msra.mxu1 %v843_v10 }
 0x248   : > { %v2929_v15 = vpop.f32.mrf.mxu2 }
 0x249   : > { %v902_v49 = vsel %vm877_vm1, %v2929_v15, -inf }
 0x24a   : > { %v2933_v16 = vpop.f32.mrf.mxu1  ;;  %903 = vmax.xlane.f32.xlu1 %v902_v49 }
 0x24b   : > { %v896_v36 = vsel %vm877_vm1, %v2933_v16, -inf }
 0x24c   : > { %1432 = vrot.lane.b32.xlu2 %v2825_v33, %s2572_s14 }
 0x24e   : > { %854 = vmatpush.bf16.xpose.msra.mxu1 %v840_v60 }
 0x250   : > { %v2938_v17 = vpop.f32.mrf.mxu2 }
 0x251   : > { %v905_v33 = vsel %vm877_vm1, %v2938_v17, -inf }
 0x252   : > { %v2940_v18 = vpop.f32.mrf.mxu1 }
 0x253   : > { %v899_v19 = vsel %vm877_vm1, %v2940_v18, -inf }
 0x254   : > { %900 = vmax.xlane.f32.xlu0 %v899_v19 }
 0x256   : > { %855 = vmatpush.bf16.xpose.msra.mxu1 %v837_v20 }
 0x258   : > { %v2945_v21 = vpop.f32.mrf.mxu2 }
 0x259   : > { %v908_v26 = vsel %vm877_vm1, %v2945_v21, -inf }
 0x25c   : > { %906 = vmax.xlane.f32.xlu0 %v905_v33 }
 0x25d   : > { %2156 = vmatmul.msk.bf16.vlgmr.msra.gmra.mxu1 %vm580_vm0, %v2851_v63 }
 0x25e   : > { %1456 = vmatpush.bf16.msrb.mxu1 %v1435_v58 }
 0x260   : > { %v2951_v24 = vpop.f32.mrf.mxu2 }
 0x261   : > { %v911_v25 = vsel %vm877_vm1, %v2951_v24, -inf }
 0x262   : > { %912 = vmax.xlane.f32.xlu1 %v911_v25 }
 0x264   : > { %909 = vmax.xlane.f32.xlu0 %v908_v26 }
 0x268   : > { %v2957_v27 = vpop.f32.mrf.mxu2 }
 0x269   : > { %v914_v29 = vsel %vm877_vm1, %v2957_v27, -inf }
 0x26a   : > { %915 = vmax.xlane.f32.xlu1 %v914_v29 }
 0x26d   : > { %2157 = vmatmul.msk.bf16.gmra.mxu1 %vm580_vm0, %v2860_v13 }
 0x270   : > { %v2963_v31 = vpop.f32.mrf.mxu2 }
 0x271   : > { %v917_v54 = vsel %vm877_vm1, %v2963_v31, -inf }
 0x272   : > { %918 = vmax.xlane.f32.xlu0 %v917_v54 }
 0x275   : > { %891 = vmax.xlane.f32.xlu2 %v890_v32 }
 0x278   : > { %v2969_v34 = vpop.f32.mrf.mxu2 }
 0x279   : > { %v920_v35 = vsel %vm877_vm1, %v2969_v34, -inf }
 0x27a   : > { %921 = vmax.xlane.f32.xlu0 %v920_v35 }
 0x27d   : > { %897 = vmax.xlane.f32.xlu2 %v896_v36  ;;  %2158 = vmatmul.msk.bf16.gmra.mxu1 %vm580_vm0, %v2870_v28 }
 0x280   : > { %v2977_v37 = vpop.f32.mrf.mxu2 }
 0x281   : > { %v923_v38 = vsel %vm877_vm1, %v2977_v37, -inf }
 0x282   : > { %v2984_v42 = vpop.f32.mrf.mxu1 }
 0x283   : > { %v926_v52 = vsel %vm877_vm1, %v2984_v42, -inf }
 0x285   : > { %924 = vmax.xlane.f32.xlu2 %v923_v38 }
 0x28a   : > { %v2991_v48 = vpop.f32.mrf.mxu1 }
 0x28b   : > { %v929_v58 = vsel %vm877_vm1, %v2991_v48, -inf }
 0x28d   : > { %2159 = vmatmul.msk.bf16.gmra.mxu1 %vm580_vm0, %v2881_v44 }
 0x28f   : > { %v880_v39 = vpop.xlane.xlu2 %879 }
 0x290   : > { %v974_v40 = vsub.f32 %v2901_v0, %v880_v39 }
 0x292   : > { %v1006_v22 = vmul.f32 1.442695, %v974_v40  ;;  %v3000_v53 = vpop.f32.mrf.mxu1 }
 0x293   : > { %v932_v3 = vsel %vm877_vm1, %v3000_v53, -inf }
 0x294   : > { %2310 = vpow2.f32 %v1006_v22 }
 0x297   : > { %v883_v41 = vpop.xlane.xlu0 %882 }
 0x298   : > { %v975_v45 = vsub.f32 %v2905_v56, %v883_v41 }
 0x29a   : > { %v2987_v46 = vpop.eup %2310  ;;  %v1008_v47 = vmul.f32 1.442695, %v975_v45  ;;  %v3009_v62 = vpop.f32.mrf.mxu1 }
 0x29b   : > { %v1070_v30 = vsel %vm877_vm1, %v2987_v46, 0.0  ;;  %v935_v11 = vsel %vm877_vm1, %v3009_v62, -inf }
 0x29c   : > { %2312 = vpow2.f32 %v1008_v47  ;;  %1071 = vadd.xlane.f32.xlu2 %v1070_v30 }
 0x29f   : > { %v886_v50 = vpop.xlane.xlu1 %885 }
 0x2a0   : > { %v976_v14 = vsub.f32 %v2911_v59, %v886_v50 }
 0x2a2   : > { %v2994_v51 = vpop.eup %2312  ;;  %v1010_v43 = vmul.f32 1.442695, %v976_v14  ;;  %v3018_v8 = vpop.f32.mrf.mxu1 }
 0x2a3   : > { %v1073_v5 = vsel %vm877_vm1, %v2994_v51, 0.0  ;;  %v938_v60 = vsel %vm877_vm1, %v3018_v8, -inf }
 0x2a4   : > { %2314 = vpow2.f32 %v1010_v43  ;;  %1074 = vadd.xlane.f32.xlu0 %v1073_v5  ;;  %927 = vmax.xlane.f32.xlu2 %v926_v52 }
 0x2a7   : > { %v889_v0 = vpop.xlane.xlu2 %888 }
 0x2a8   : > { %v977_v55 = vsub.f32 %v2915_v1, %v889_v0 }
 0x2aa   : > { %v3003_v56 = vpop.eup %2314  ;;  %v1012_v57 = vmul.f32 1.442695, %v977_v55  ;;  %v3028_v20 = vpop.f32.mrf.mxu1 }
 0x2ab   : > { %v1076_v59 = vsel %vm877_vm1, %v3003_v56, 0.0  ;;  %v941_v26 = vsel %vm877_vm1, %v3028_v20, -inf }
 0x2ac   : > { %2316 = vpow2.f32 %v1012_v57  ;;  %930 = vmax.xlane.f32.xlu0 %v929_v58  ;;  %1077 = vadd.xlane.f32.xlu2 %v1076_v59 }
 0x2af   : > { %v1433_v61 = vpop.permute.xlu2 %1432 }
 0x2b0   : > { %1457 = vmatpush.bf16.msrb.mxu1 %v1433_v61 }
 0x2b2   : > { %v3011_v2 = vpop.eup %2316  ;;  %v3033_v54 = vpop.f32.mrf.mxu1 }
 0x2b3   : > { %v1079_v1 = vsel %vm877_vm1, %v3011_v2, 0.0 }
 0x2b4   : > { %1080 = vadd.xlane.f32.xlu1 %v1079_v1  ;;  %933 = vmax.xlane.f32.xlu0 %v932_v3 }
 0x2b7   : > { %v895_v6 = vpop.xlane.xlu0 %894 }
 0x2b8   : > { %v979_v7 = vsub.f32 %v2924_v9, %v895_v6 }
 0x2ba   : > { %v1016_v10 = vmul.f32 1.442695, %v979_v7 }
 0x2bc   : > { %2318 = vpow2.f32 %v1016_v10  ;;  %936 = vmax.xlane.f32.xlu1 %v935_v11 }
 0x2bd   : > { %v904_v29 = vpop.xlane.xlu1 %903 }
 0x2be   : > { %v982_v35 = vsub.f32 %v2929_v15, %v904_v29 }
 0x2c0   : > { %v1022_v39 = vmul.f32 1.442695, %v982_v35 }
 0x2c2   : > { %v3022_v49 = vpop.eup %2318 }
 0x2c3   : > { %v1085_v19 = vsel %vm877_vm1, %v3022_v49, 0.0 }
 0x2c4   : > { %939 = vmax.xlane.f32.xlu1 %v938_v60  ;;  %1086 = vadd.xlane.f32.xlu2 %v1085_v19 }
 0x2c7   : > { %v901_v9 = vpop.xlane.xlu0 %900 }
 0x2c8   : > { %v981_v33 = vsub.f32 %v2940_v18, %v901_v9  ;;  %v3040_v18 = vpop.f32.mrf.mxu1 }
 0x2c9   : > { %v947_v22 = vsel %vm877_vm1, %v3040_v18, -inf }
 0x2ca   : > { %v1020_v25 = vmul.f32 1.442695, %v981_v33 }
 0x2cc   : > { %2320 = vpow2.f32 %v1020_v25  ;;  %942 = vmax.xlane.f32.xlu2 %v941_v26 }
 0x2cd   : > { %2322 = vpow2.f32 %v1022_v39 }
 0x2cf   : > { %v907_v41 = vpop.xlane.xlu0 %906 }
 0x2d0   : > { %v983_v35 = vsub.f32 %v2938_v17, %v907_v41 }
 0x2d2   : > { %v3035_v32 = vpop.eup %2320 }
 0x2d3   : > { %v1091_v36 = vsel %vm877_vm1, %v3035_v32, 0.0  ;;  %v3045_v30 = vpop.eup %2322 }
 0x2d4   : > { %1092 = vadd.xlane.f32.xlu1 %v1091_v36  ;;  %v1094_v14 = vsel %vm877_vm1, %v3045_v30, 0.0 }
 0x2d5   : > { %v913_v38 = vpop.xlane.xlu1 %912 }
 0x2d6   : > { %v985_v40 = vsub.f32 %v2951_v24, %v913_v38  ;;  %v1024_v38 = vmul.f32 1.442695, %v983_v35 }
 0x2d7   : > { %v910_v43 = vpop.xlane.xlu0 %909 }
 0x2d8   : > { %v1028_v45 = vmul.f32 1.442695, %v985_v40 }
 0x2da   : > { %2324 = vpow2.f32 %v1028_v45  ;;  %v3047_v15 = vpop.f32.mrf.mxu1  ;;  %v984_v45 = vsub.f32 %v2945_v21, %v910_v43 }
 0x2db   : > { %v950_v36 = vsel %vm877_vm1, %v3047_v15, -inf }
 0x2dc   : > { %948 = vmax.xlane.f32.xlu1 %v947_v22 }
 0x2dd   : > { %v916_v47 = vpop.xlane.xlu1 %915 }
 0x2de   : > { %v986_v50 = vsub.f32 %v2957_v27, %v916_v47  ;;  %v1026_v47 = vmul.f32 1.442695, %v984_v45 }
 0x2e0   : > { %v1030_v24 = vmul.f32 1.442695, %v986_v50  ;;  %v3052_v5 = vpop.eup %2324 }
 0x2e1   : > { %v1103_v57 = vsel %vm877_vm1, %v3052_v5, 0.0 }
 0x2e2   : > { %2326 = vpow2.f32 %v1030_v24  ;;  %v3057_v58 = vpop.f32.mrf.mxu1 }
 0x2e3   : > { %v953_v17 = vsel %vm877_vm1, %v3057_v58, -inf }
 0x2e4   : > { %1095 = vadd.xlane.f32.xlu1 %v1094_v14 }
 0x2e5   : > { %v919_v27 = vpop.xlane.xlu0 %918 }
 0x2e6   : > { %v987_v6 = vsub.f32 %v2963_v31, %v919_v27  ;;  %v944_v31 = vsel %vm877_vm1, %v3033_v54, -inf }
 0x2e8   : > { %v892_v52 = vpop.xlane.xlu2 %891  ;;  %v3059_v59 = vpop.eup %2326  ;;  %v1032_v60 = vmul.f32 1.442695, %v987_v6 }
 0x2e9   : > { %v978_v0 = vsub.f32 %v2921_v4, %v892_v52  ;;  %v1106_v7 = vsel %vm877_vm1, %v3059_v59, 0.0 }
 0x2ea   : > { %v3069_v11 = vpop.f32.mrf.mxu1 }
 0x2eb   : > { %v1014_v55 = vmul.f32 1.442695, %v978_v0 }
 0x2ec   : > { %1104 = vadd.xlane.f32.xlu1 %v1103_v57 }
 0x2ed   : > { %2328 = vpow2.f32 %v1014_v55  ;;  %v922_v19 = vpop.xlane.xlu0 %921 }
 0x2f0   : > { %v898_v61 = vpop.xlane.xlu2 %897 }
 0x2f1   : > { %v980_v1 = vsub.f32 %v2933_v16, %v898_v61  ;;  %v988_v16 = vsub.f32 %v2969_v34, %v922_v19 }
 0x2f2   : > { %v3078_v26 = vpop.f32.mrf.mxu1 }
 0x2f3   : > { %v3062_v3 = vpop.eup %2328  ;;  %v1018_v4 = vmul.f32 1.442695, %v980_v1  ;;  %v1034_v25 = vmul.f32 1.442695, %v988_v16  ;;  %v959_v43 = vsel %vm877_vm1, %v3078_v26, -inf }
 0x2f4   : > { %1107 = vadd.xlane.f32.xlu1 %v1106_v7  ;;  %v1082_v10 = vsel %vm877_vm1, %v3062_v3, 0.0 }
 0x2f5   : > { %2330 = vpow2.f32 %v1018_v4  ;;  %1083 = vadd.xlane.f32.xlu0 %v1082_v10 }
 0x2f6   : > { %2332 = vpow2.f32 %v1032_v60 }
 0x2f7   : > { %2334 = vpow2.f32 %v1034_v25 }
 0x2f8   : > { %v3087_v39 = vpop.xlane.xlu2 %924  ;;  %2336 = vpow2.f32 %v1024_v38 }
 0x2fa   : > { %v3091_v22 = vpop.f32.mrf.mxu1 }
 0x2fb   : > { %v3071_v9 = vpop.eup %2330 }
 0x2fc   : > { %v1088_v33 = vsel %vm877_vm1, %v3071_v9, 0.0  ;;  %v3080_v29 = vpop.eup %2332 }
 0x2fd   : > { %945 = vmax.xlane.f32.xlu0 %v944_v31  ;;  %1089 = vadd.xlane.f32.xlu2 %v1088_v33  ;;  %v1109_v34 = vsel %vm877_vm1, %v3080_v29, 0.0  ;;  %v3089_v40 = vpop.eup %2334 }
 0x2fe   : > { %v1112_v41 = vsel %vm877_vm1, %v3089_v40, 0.0  ;;  %v3100_v14 = vpop.eup %2336 }
 0x2ff   : > { %v1097_v21 = vsel %vm877_vm1, %v3100_v14, 0.0 }
 0x302   : > { %v3102_v24 = vpop.f32.mrf.mxu1 }
 0x305   : > { %951 = vmax.xlane.f32.xlu0 %v950_v36  ;;  %1110 = vadd.xlane.f32.xlu2 %v1109_v34 }
 0x30a   : > { %v3114_v4 = vpop.f32.mrf.mxu1 }
 0x30d   : > { %954 = vmax.xlane.f32.xlu0 %v953_v17  ;;  %1113 = vadd.xlane.f32.xlu2 %v1112_v41 }
 0x30e   : > { %1428 = vrot.lane.b32.xlu1 %v2805_v12, %s2572_s14 }
 0x30f   : > { %v1072_v50 = vpop.xlane.xlu2 %1071 }
 0x310   : > { %2338 = vrcp.f32 %v1072_v50 }
 0x311   : > { %2340 = vpow2.f32 %v1026_v47 }
 0x312   : > { %v3122_v36 = vpop.f32.mrf.mxu1 }
 0x315   : > { %1098 = vadd.xlane.f32.xlu0 %v1097_v21  ;;  %960 = vmax.xlane.f32.xlu2 %v959_v43 }
 0x316   : > { %v2339_v55 = vpop.eup %2338 }
 0x317   : > { %v1075_v52 = vpop.xlane.xlu0 %1074  ;;  %v928_v0 = vpop.xlane.xlu2 %927  ;;  %v1198_v61 = vmul.f32 %v2339_v55, %v2987_v46 }
 0x318   : > { %2342 = vrcp.f32 %v1075_v52  ;;  %v990_v12 = vsub.f32 %v2984_v42, %v928_v0  ;;  %v3109_v57 = vpop.eup %2340 }
 0x319   : > { %v1100_v1 = vsel %vm877_vm1, %v3109_v57, 0.0  ;;  %v1230_v7 = vpack.c.bf16 %v1198_v61, %v1198_v61 }
 0x31a   : > { %v1038_v27 = vmul.f32 1.442695, %v990_v12 }
 0x31b   : > { %v1270_v42 = vunpack.c.l.b16 %v1230_v7 }
 0x31c   : > { %2344 = vpow2.f32 %v1038_v27 }
 0x31d   : > { %1101 = vadd.xlane.f32.xlu0 %v1100_v1 }
 0x31e   : > { %v2343_v6 = vpop.eup %2342 }
 0x31f   : > { %v1199_v10 = vmul.f32 %v2343_v6, %v2994_v51  ;;  %v1078_v60 = vpop.xlane.xlu2 %1077  ;;  %v971_v51 = vsel %vm877_vm1, %v3122_v36, -inf  ;;  %v931_v7 = vpop.xlane.xlu0 %930 }
 0x320   : > { %2346 = vrcp.f32 %v1078_v60 }
 0x321   : > { %v1231_v19 = vpack.c.bf16 %v1199_v10, %v1199_v10 }
 0x322   : > { %v3117_v16 = vpop.eup %2344 }
 0x323   : > { %v1271_v31 = vunpack.c.l.b16 %v1231_v19  ;;  %v1118_v46 = vsel %vm877_vm1, %v3117_v16, 0.0 }
 0x324   : > { %1119 = vadd.xlane.f32.xlu2 %v1118_v46 }
 0x325   : > { %v1278_v33 = vpack.c.b16 %v1271_v31, %v1270_v42 }
 0x326   : > { %v2347_v35 = vpop.eup %2346 }
 0x327   : > { %2160 = vmatmul.msk.bf16.vlgmr.msrb.gmra.mxu2 %vm877_vm1, %v1278_v33  ;;  %v1081_v25 = vpop.xlane.xlu1 %1080  ;;  %v1200_v34 = vmul.f32 %v2347_v35, %v3003_v56  ;;  %v962_v56 = vsel %vm877_vm1, %v3091_v22, -inf }
 0x328   : > { %2348 = vrcp.f32 %v1081_v25 }
 0x329   : > { %v1232_v41 = vpack.c.bf16 %v1200_v34, %v1200_v34 }
 0x32b   : > { %v1272_v43 = vunpack.c.l.b16 %v1232_v41 }
 0x32c   : > { %972 = vmax.xlane.f32.xlu2 %v971_v51  ;;  %v956_v51 = vsel %vm877_vm1, %v3069_v11, -inf }
 0x32e   : > { %v2349_v38 = vpop.eup %2348 }
 0x32f   : > { %v937_v45 = vpop.xlane.xlu1 %936  ;;  %v1201_v17 = vmul.f32 %v2349_v38, %v3011_v2 }
 0x330   : > { %v993_v47 = vsub.f32 %v3009_v62, %v937_v45 }
 0x331   : > { %1430 = vrot.lane.b32.xlu0 %v2813_v23, %s2572_s14  ;;  %v1233_v50 = vpack.c.bf16 %v1201_v17, %v1201_v17 }
 0x332   : > { %v1044_v21 = vmul.f32 1.442695, %v993_v47 }
 0x333   : > { %v1273_v52 = vunpack.c.l.b16 %v1233_v50 }
 0x334   : > { %2350 = vpow2.f32 %v1044_v21 }
 0x335   : > { %v1279_v0 = vpack.c.b16 %v1273_v52, %v1272_v43 }
 0x337   : > { %2161 = vmatmul.msk.bf16.gmra.mxu2 %vm877_vm1, %v1279_v0  ;;  %v940_v55 = vpop.xlane.xlu1 %939  ;;  %v1087_v42 = vpop.xlane.xlu2 %1086 }
 0x338   : > { %963 = vmax.xlane.f32.xlu1 %v962_v56  ;;  %v994_v2 = vsub.f32 %v3018_v8, %v940_v55  ;;  %v989_v8 = vsub.f32 %v2977_v37, %v3087_v39  ;;  %v991_v39 = vsub.f32 %v2991_v48, %v931_v7  ;;  %v965_v48 = vsel %vm877_vm1, %v3102_v24, -inf }
 0x33a   : > { %v1046_v12 = vmul.f32 1.442695, %v994_v2  ;;  %v3135_v62 = vpop.eup %2350  ;;  %v1036_v6 = vmul.f32 1.442695, %v989_v8 }
 0x33b   : > { %v1127_v23 = vsel %vm877_vm1, %v3135_v62, 0.0 }
 0x33c   : > { %2352 = vpow2.f32 %v1046_v12 }
 0x33d   : > { %2354 = vpow2.f32 %v1036_v6 }
 0x33f   : > { %v943_v35 = vpop.xlane.xlu2 %942 }
 0x340   : > { %1128 = vadd.xlane.f32.xlu1 %v1127_v23  ;;  %v995_v34 = vsub.f32 %v3028_v20, %v943_v35 }
 0x342   : > { %v3139_v27 = vpop.eup %2352  ;;  %v1048_v38 = vmul.f32 1.442695, %v995_v34 }
 0x343   : > { %v1130_v61 = vsel %vm877_vm1, %v3139_v27, 0.0  ;;  %v3148_v31 = vpop.eup %2354 }
 0x344   : > { %1507 = vrot.lane.b32.xlu2 %v2881_v44, %s2572_s14  ;;  %v934_v44 = vpop.xlane.xlu0 %933  ;;  %v1115_v25 = vsel %vm877_vm1, %v3148_v31, 0.0 }
 0x345   : > { %v992_v33 = vsub.f32 %v3000_v53, %v934_v44  ;;  %v1040_v53 = vmul.f32 1.442695, %v991_v39 }
 0x347   : > { %v1093_v1 = vpop.xlane.xlu1 %1092 }
 0x348   : > { %1131 = vadd.xlane.f32.xlu1 %v1130_v61 }
 0x34f   : > { %v949_v10 = vpop.xlane.xlu1 %948 }
 0x350   : > { %v997_v60 = vsub.f32 %v3040_v18, %v949_v10  ;;  %v1042_v18 = vmul.f32 1.442695, %v992_v33 }
 0x352   : > { %v1052_v19 = vmul.f32 1.442695, %v997_v60 }
 0x354   : > { %2356 = vpow2.f32 %v1052_v19 }
 0x355   : > { %2358 = vpow2.f32 %v1042_v18 }
 0x356   : > { %2360 = vrcp.f32 %v1087_v42 }
 0x357   : > { %2362 = vpow2.f32 %v1040_v53 }
 0x35a   : > { %v3150_v46 = vpop.eup %2356 }
 0x35b   : > { %1116 = vadd.xlane.f32.xlu0 %v1115_v25  ;;  %v1139_v37 = vsel %vm877_vm1, %v3150_v46, 0.0  ;;  %v3161_v45 = vpop.eup %2358 }
 0x35c   : > { %1140 = vadd.xlane.f32.xlu1 %v1139_v37  ;;  %v2361_v41 = vpop.eup %2360  ;;  %v1124_v47 = vsel %vm877_vm1, %v3161_v45, 0.0 }
 0x35d   : > { %v1203_v50 = vmul.f32 %v2361_v41, %v3022_v49  ;;  %v3168_v20 = vpop.eup %2362 }
 0x35e   : > { %v1121_v12 = vsel %vm877_vm1, %v3168_v20, 0.0 }
 0x35f   : > { %v1235_v56 = vpack.c.bf16 %v1203_v50, %v1203_v50 }
 0x361   : > { %v1275_v6 = vunpack.c.l.b16 %v1235_v56 }
 0x363   : > { %957 = vmax.xlane.f32.xlu0 %v956_v51 }
 0x368   : > { %v1084_v17 = vpop.xlane.xlu0 %1083 }
 0x369   : > { %2364 = vrcp.f32 %v1084_v17 }
 0x36a   : > { %2366 = vpow2.f32 %v1048_v38 }
 0x36b   : > { %966 = vmax.xlane.f32.xlu0 %v965_v48 }
 0x36d   : > { %1125 = vadd.xlane.f32.xlu2 %v1124_v47 }
 0x36f   : > { %v2365_v21 = vpop.eup %2364 }
 0x370   : > { %v946_v43 = vpop.xlane.xlu0 %945  ;;  %v1090_v52 = vpop.xlane.xlu2 %1089  ;;  %v1202_v0 = vmul.f32 %v2365_v21, %v3062_v3 }
 0x371   : > { %v3171_v55 = vpop.eup %2366  ;;  %v996_v2 = vsub.f32 %v3033_v54, %v946_v43  ;;  %2368 = vrcp.f32 %v1090_v52  ;;  %v2222_v43 = vld [vmem:[%s312_s11 + $0x8] sm:$0xff] }
 0x372   : > { %v1234_v23 = vpack.c.bf16 %v1202_v0, %v1202_v0  ;;  %2370 = vrcp.f32 %v1093_v1  ;;  %v1133_v61 = vsel %vm877_vm1, %v3171_v55, 0.0  ;;  %v968_v1 = vsel %vm877_vm1, %v3114_v4, -inf  ;;  %1640 = vmatpush.bf16.msra.mxu3 %v2222_v43 }
 0x373   : > { %v1050_v49 = vmul.f32 1.442695, %v996_v2  ;;  %1122 = vadd.xlane.f32.xlu0 %v1121_v12 }
 0x374   : > { %v1274_v8 = vunpack.c.l.b16 %v1234_v23 }
 0x375   : > { %2372 = vpow2.f32 %v1050_v49  ;;  %1134 = vadd.xlane.f32.xlu2 %v1133_v61  ;;  %v2221_v49 = vld [vmem:[%s312_s11] sm:$0xff] }
 0x376   : > { %v1280_v3 = vpack.c.b16 %v1275_v6, %v1274_v8  ;;  %1641 = vmatpush.bf16.msra.mxu3 %v2221_v49 }
 0x377   : > { %v2369_v7 = vpop.eup %2368 }
 0x378   : > { %v952_v10 = vpop.xlane.xlu0 %951  ;;  %2162 = vmatmul.msk.bf16.gmra.mxu2 %vm877_vm1, %v1280_v3  ;;  %v2371_v54 = vpop.eup %2370  ;;  %v1204_v19 = vmul.f32 %v2369_v7, %v3071_v9 }
 0x379   : > { %v998_v60 = vsub.f32 %v3047_v15, %v952_v10  ;;  %v1111_v33 = vpop.xlane.xlu2 %1110  ;;  %v1205_v37 = vmul.f32 %v2371_v54, %v3035_v32  ;;  %v1096_v15 = vpop.xlane.xlu1 %1095 }
 0x37a   : > { %v1236_v18 = vpack.c.bf16 %v1204_v19, %v1204_v19 }
 0x37b   : > { %v3183_v42 = vpop.eup %2372  ;;  %v1054_v44 = vmul.f32 1.442695, %v998_v60  ;;  %969 = vmax.xlane.f32.xlu0 %v968_v1  ;;  %v1237_v35 = vpack.c.bf16 %v1205_v37, %v1205_v37 }
 0x37c   : > { %v1136_v25 = vsel %vm877_vm1, %v3183_v42, 0.0  ;;  %v1276_v9 = vunpack.c.l.b16 %v1236_v18 }
 0x37d   : > { %2374 = vpow2.f32 %v1054_v44  ;;  %1137 = vadd.xlane.f32.xlu2 %v1136_v25  ;;  %v1277_v17 = vunpack.c.l.b16 %v1237_v35 }
 0x37e   : > { %2376 = vrcp.f32 %v1096_v15 }
 0x37f   : > { %v1281_v41 = vpack.c.b16 %v1277_v17, %v1276_v9 }
 0x380   : > { %v955_v39 = vpop.xlane.xlu0 %954 }
 0x381   : > { %v999_v51 = vsub.f32 %v3057_v58, %v955_v39  ;;  %v3193_v32 = vpop.xlane.xlu2 %1113  ;;  %v1105_v2 = vpop.xlane.xlu1 %1104 }
 0x383   : > { %v3189_v34 = vpop.eup %2374  ;;  %v1056_v53 = vmul.f32 1.442695, %v999_v51 }
 0x384   : > { %v1142_v38 = vsel %vm877_vm1, %v3189_v34, 0.0  ;;  %v2377_v47 = vpop.eup %2376 }
 0x385   : > { %2378 = vpow2.f32 %v1056_v53  ;;  %1143 = vadd.xlane.f32.xlu1 %v1142_v38  ;;  %v1206_v50 = vmul.f32 %v2377_v47, %v3045_v30 }
 0x387   : > { %v1238_v56 = vpack.c.bf16 %v1206_v50, %v1206_v50 }
 0x388   : > { %v1099_v48 = vpop.xlane.xlu0 %1098  ;;  %2163 = vmatmul.msk.bf16.gmra.mxu2 %vm877_vm1, %v1281_v41 }
 0x389   : > { %2380 = vrcp.f32 %v1099_v48  ;;  %v961_v0 = vpop.xlane.xlu2 %960  ;;  %v1343_v8 = vunpack.c.l.b16 %v1238_v56  ;;  %v1108_v54 = vpop.xlane.xlu1 %1107 }
 0x38a   : > { %v1001_v50 = vsub.f32 %v3078_v26, %v961_v0 }
 0x38b   : > { %v3200_v58 = vpop.eup %2378 }
 0x38c   : > { %v1145_v21 = vsel %vm877_vm1, %v3200_v58, 0.0 }
 0x38d   : > { %1146 = vadd.xlane.f32.xlu0 %v1145_v21 }
 0x38f   : > { %v2381_v52 = vpop.eup %2380 }
 0x390   : > { %v1207_v12 = vmul.f32 %v2381_v52, %v3100_v14  ;;  %v1102_v23 = vpop.xlane.xlu0 %1101 }
 0x391   : > { %2382 = vrcp.f32 %v1102_v23  ;;  %v1429_v25 = vpop.permute.xlu1 %1428 }
 0x392   : > { %v1239_v61 = vpack.c.bf16 %v1207_v12, %v1207_v12  ;;  %2384 = vrcp.f32 %v1105_v2 }
 0x393   : > { %2386 = vrcp.f32 %v1111_v33 }
 0x394   : > { %v1344_v30 = vunpack.c.l.b16 %v1239_v61  ;;  %2388 = vrcp.f32 %v1108_v54 }
 0x395   : > { %1501 = vrot.lane.b32.xlu2 %v2851_v63, %s2572_s14 }
 0x396   : > { %v1351_v6 = vpack.c.b16 %v1344_v30, %v1343_v8 }
 0x397   : > { %v2383_v3 = vpop.eup %2382  ;;  %v3208_v7 = vpop.xlane.xlu2 %1119 }
 0x398   : > { %2164 = vmatmul.msk.bf16.vlgmr.msra.gmra.mxu2 %vm877_vm1, %v1351_v6  ;;  %v2385_v10 = vpop.eup %2384  ;;  %v1208_v14 = vmul.f32 %v2383_v3, %v3109_v57 }
 0x399   : > { %v1209_v60 = vmul.f32 %v2385_v10, %v3052_v5  ;;  %v2387_v15 = vpop.eup %2386 }
 0x39a   : > { %v1240_v1 = vpack.c.bf16 %v1208_v14, %v1208_v14  ;;  %v1211_v33 = vmul.f32 %v2387_v15, %v3080_v29 }
 0x39b   : > { %v1241_v44 = vpack.c.bf16 %v1209_v60, %v1209_v60 }
 0x39c   : > { %v1345_v63 = vunpack.c.l.b16 %v1240_v1  ;;  %v1243_v9 = vpack.c.bf16 %v1211_v33, %v1211_v33 }
 0x39d   : > { %v1346_v18 = vunpack.c.l.b16 %v1241_v44 }
 0x39e   : > { %1505 = vrot.lane.b32.xlu1 %v2870_v28, %s2572_s14  ;;  %v2389_v28 = vpop.eup %2388  ;;  %v1348_v41 = vunpack.c.l.b16 %v1243_v9 }
 0x39f   : > { %v973_v19 = vpop.xlane.xlu2 %972  ;;  %v1352_v57 = vpack.c.b16 %v1346_v18, %v1345_v63  ;;  %v1210_v51 = vmul.f32 %v2389_v28, %v3059_v59 }
 0x3a0   : > { %v1005_v52 = vsub.f32 %v3122_v36, %v973_v19 }
 0x3a1   : > { %1503 = vrot.lane.b32.xlu0 %v2860_v13, %s2572_s14  ;;  %v1242_v38 = vpack.c.bf16 %v1210_v51, %v1210_v51 }
 0x3a2   : > { %v1068_v56 = vmul.f32 1.442695, %v1005_v52 }
 0x3a3   : > { %v1431_v37 = vpop.permute.xlu0 %1430  ;;  %v1347_v47 = vunpack.c.l.b16 %v1242_v38 }
 0x3a4   : > { %1458 = vmatpush.bf16.msrb.mxu1 %v1431_v37 }
 0x3a5   : > { %v1353_v21 = vpack.c.b16 %v1348_v41, %v1347_v47 }
 0x3a7   : > { %v1508_v39 = vpop.permute.xlu2 %1507 }
 0x3a8   : > { %2165 = vmatmul.msk.bf16.gmra.mxu2 %vm877_vm1, %v1352_v57  ;;  %1459 = vmatpush.bf16.msrb.mxu1 %v1429_v25 }
 0x3a9   : > { %1529 = vmatpush.bf16.msrb.mxu2 %v1508_v39 }
 0x3aa   : > { %v1315_v5 = vpop.f32.mrf.mxu2 }
 0x3ab   : > { %v964_v35 = vpop.xlane.xlu1 %963 }
 0x3ac   : > { %v1002_v13 = vsub.f32 %v3091_v22, %v964_v35  ;;  %v1060_v22 = vmul.f32 1.442695, %v1001_v50 }
 0x3ae   : > { %v1062_v53 = vmul.f32 1.442695, %v1002_v13 }
 0x3b0   : > { %2390 = vpow2.f32 %v1062_v53 }
 0x3b1   : > { %2392 = vpow2.f32 %v1060_v22 }
 0x3b2   : > { %v1317_v17 = vpop.f32.mrf.mxu2  ;;  %2394 = vpow2.f32 %v1068_v56 }
 0x3b3   : > { %v1554_v48 = vpack.c.bf16 %v1317_v17, %v1315_v5  ;;  %2396 = vrcp.f32 %v3193_v32  ;;  %v1129_v15 = vpop.xlane.xlu1 %1128 }
 0x3b5   : > { %2184 = vmatmul.msk.bf16.vlgmr.msra.gmra.mxu3 %vm580_vm0, %v1554_v48 }
 0x3b6   : > { %v3224_v29 = vpop.eup %2390 }
 0x3b7   : > { %v1154_v59 = vsel %vm877_vm1, %v3224_v29, 0.0  ;;  %v3229_v23 = vpop.eup %2392 }
 0x3b8   : > { %2166 = vmatmul.msk.bf16.gmra.mxu2 %vm877_vm1, %v1353_v21  ;;  %v1151_v26 = vsel %vm877_vm1, %v3229_v23, 0.0  ;;  %v3235_v0 = vpop.eup %2394 }
 0x3b9   : > { %v2397_v61 = vpop.eup %2396  ;;  %v1163_v36 = vsel %vm877_vm1, %v3235_v0, 0.0 }
 0x3ba   : > { %v1320_v43 = vpop.f32.mrf.mxu2  ;;  %v1212_v8 = vmul.f32 %v2397_v61, %v3089_v40 }
 0x3bc   : > { %v1244_v10 = vpack.c.bf16 %v1212_v8, %v1212_v8 }
 0x3be   : > { %1155 = vadd.xlane.f32.xlu2 %v1154_v59  ;;  %v1349_v60 = vunpack.c.l.b16 %v1244_v10 }
 0x3c2   : > { %v1322_v2 = vpop.f32.mrf.mxu2 }
 0x3c3   : > { %v1555_v12 = vpack.c.bf16 %v1322_v2, %v1320_v43 }
 0x3c5   : > { %2185 = vmatmul.msk.bf16.gmra.mxu3 %vm580_vm0, %v1555_v12 }
 0x3c8   : > { %1152 = vadd.xlane.f32.xlu1 %v1151_v26 }
 0x3ce   : > { %v1117_v49 = vpop.xlane.xlu0 %1116 }
 0x3cf   : > { %2398 = vrcp.f32 %v1117_v49 }
 0x3d0   : > { %1164 = vadd.xlane.f32.xlu1 %v1163_v36 }
 0x3d5   : > { %v2399_v30 = vpop.eup %2398 }
 0x3d6   : > { %v958_v6 = vpop.xlane.xlu0 %957  ;;  %v1213_v3 = vmul.f32 %v2399_v30, %v3148_v31 }
 0x3d7   : > { %v1000_v14 = vsub.f32 %v3069_v11, %v958_v6 }
 0x3d8   : > { %v1245_v54 = vpack.c.bf16 %v1213_v3, %v1213_v3 }
 0x3d9   : > { %v1058_v32 = vmul.f32 1.442695, %v1000_v14 }
 0x3da   : > { %v1350_v1 = vunpack.c.l.b16 %v1245_v54 }
 0x3db   : > { %2400 = vpow2.f32 %v1058_v32 }
 0x3dc   : > { %v1354_v19 = vpack.c.b16 %v1350_v1, %v1349_v60  ;;  %2402 = vrcp.f32 %v3208_v7 }
 0x3de   : > { %v967_v44 = vpop.xlane.xlu0 %966  ;;  %2167 = vmatmul.msk.bf16.gmra.mxu2 %vm877_vm1, %v1354_v19 }
 0x3df   : > { %v1003_v63 = vsub.f32 %v3102_v24, %v967_v44 }
 0x3e0   : > { %v1126_v39 = vpop.xlane.xlu2 %1125 }
 0x3e1   : > { %v3244_v25 = vpop.eup %2400  ;;  %v1064_v40 = vmul.f32 1.442695, %v1003_v63 }
 0x3e2   : > { %v1148_v31 = vsel %vm877_vm1, %v3244_v25, 0.0  ;;  %v2403_v37 = vpop.eup %2402 }
 0x3e3   : > { %2404 = vpow2.f32 %v1064_v40  ;;  %1149 = vadd.xlane.f32.xlu0 %v1148_v31  ;;  %v1214_v57 = vmul.f32 %v2403_v37, %v3117_v16  ;;  %v1132_v16 = vpop.xlane.xlu1 %1131 }
 0x3e5   : > { %v1246_v28 = vpack.c.bf16 %v1214_v57, %v1214_v57 }
 0x3e6   : > { %v1123_v11 = vpop.xlane.xlu0 %1122 }
 0x3e7   : > { %2406 = vrcp.f32 %v1123_v11  ;;  %v1416_v9 = vunpack.c.l.b16 %v1246_v28 }
 0x3e8   : > { %2408 = vrcp.f32 %v1126_v39  ;;  %v1135_v43 = vpop.xlane.xlu2 %1134 }
 0x3e9   : > { %v3249_v18 = vpop.eup %2404  ;;  %2410 = vrcp.f32 %v1129_v15 }
 0x3ea   : > { %v1157_v24 = vsel %vm877_vm1, %v3249_v18, 0.0 }
 0x3eb   : > { %1158 = vadd.xlane.f32.xlu0 %v1157_v24  ;;  %v1141_v21 = vpop.xlane.xlu1 %1140 }
 0x3ed   : > { %v2407_v7 = vpop.eup %2406 }
 0x3ee   : > { %v1215_v5 = vmul.f32 %v2407_v7, %v3168_v20  ;;  %v970_v33 = vpop.xlane.xlu0 %969  ;;  %v2409_v17 = vpop.eup %2408 }
 0x3ef   : > { %v1004_v35 = vsub.f32 %v3114_v4, %v970_v33  ;;  %v2411_v41 = vpop.eup %2410  ;;  %v1216_v48 = vmul.f32 %v2409_v17, %v3161_v45 }
 0x3f0   : > { %v1247_v13 = vpack.c.bf16 %v1215_v5, %v1215_v5  ;;  %v1217_v20 = vmul.f32 %v2411_v41, %v3135_v62  ;;  %v1138_v10 = vpop.xlane.xlu2 %1137 }
 0x3f1   : > { %v1066_v51 = vmul.f32 1.442695, %v1004_v35  ;;  %v1248_v22 = vpack.c.bf16 %v1216_v48, %v1216_v48 }
 0x3f2   : > { %v1417_v53 = vunpack.c.l.b16 %v1247_v13  ;;  %v1249_v59 = vpack.c.bf16 %v1217_v20, %v1217_v20 }
 0x3f3   : > { %2412 = vpow2.f32 %v1066_v51  ;;  %v1418_v52 = vunpack.c.l.b16 %v1248_v22 }
 0x3f4   : > { %v1424_v38 = vpack.c.b16 %v1417_v53, %v1416_v9  ;;  %2414 = vrcp.f32 %v1135_v43  ;;  %v1419_v56 = vunpack.c.l.b16 %v1249_v59 }
 0x3f5   : > { %2416 = vrcp.f32 %v1132_v16 }
 0x3f6   : > { %2168 = vmatmul.msk.bf16.vlgmr.msrb.gmra.mxu1 %vm877_vm1, %v1424_v38  ;;  %v1425_v49 = vpack.c.b16 %v1419_v56, %v1418_v52 }
 0x3f8   : > { %v1144_v45 = vpop.xlane.xlu1 %1143  ;;  %v1502_v15 = vpop.permute.xlu2 %1501 }
 0x3f9   : > { %v3258_v47 = vpop.eup %2412 }
 0x3fa   : > { %v1160_v4 = vsel %vm877_vm1, %v3258_v47, 0.0  ;;  %v2415_v61 = vpop.eup %2414 }
 0x3fb   : > { %v1325_v50 = vpop.f32.mrf.mxu2  ;;  %1161 = vadd.xlane.f32.xlu2 %v1160_v4  ;;  %v2417_v62 = vpop.eup %2416  ;;  %v1219_v36 = vmul.f32 %v2415_v61, %v3171_v55 }
 0x3fc   : > { %v1218_v8 = vmul.f32 %v2417_v62, %v3139_v27 }
 0x3fd   : > { %v1251_v3 = vpack.c.bf16 %v1219_v36, %v1219_v36 }
 0x3fe   : > { %v1250_v54 = vpack.c.bf16 %v1218_v8, %v1218_v8 }
 0x3ff   : > { %v1421_v60 = vunpack.c.l.b16 %v1251_v3 }
 0x400   : > { %v1147_v2 = vpop.xlane.xlu0 %1146  ;;  %v1420_v44 = vunpack.c.l.b16 %v1250_v54 }
 0x401   : > { %2418 = vrcp.f32 %v1147_v2 }
 0x402   : > { %2420 = vrcp.f32 %v1144_v45  ;;  %v1426_v11 = vpack.c.b16 %v1421_v60, %v1420_v44 }
 0x403   : > { %v1327_v12 = vpop.f32.mrf.mxu2  ;;  %2422 = vrcp.f32 %v1138_v10 }
 0x404   : > { %v1556_v26 = vpack.c.bf16 %v1327_v12, %v1325_v50  ;;  %2424 = vrcp.f32 %v1141_v21 }
 0x406   : > { %2169 = vmatmul.msk.bf16.gmra.mxu1 %vm877_vm1, %v1425_v49  ;;  %2186 = vmatmul.msk.bf16.gmra.mxu3 %vm580_vm0, %v1556_v26 }
 0x407   : > { %v2419_v30 = vpop.eup %2418 }
 0x408   : > { %v2421_v14 = vpop.eup %2420  ;;  %v1223_v32 = vmul.f32 %v2419_v30, %v3200_v58 }
 0x409   : > { %v1222_v1 = vmul.f32 %v2421_v14, %v3189_v34  ;;  %v2423_v37 = vpop.eup %2422 }
 0x40a   : > { %v1255_v63 = vpack.c.bf16 %v1223_v32, %v1223_v32  ;;  %v2425_v58 = vpop.eup %2424  ;;  %v1220_v34 = vmul.f32 %v2423_v37, %v3183_v42 }
 0x40b   : > { %v1330_v6 = vpop.f32.mrf.mxu2  ;;  %v1254_v27 = vpack.c.bf16 %v1222_v1, %v1222_v1  ;;  %v1221_v39 = vmul.f32 %v2425_v58, %v3150_v46 }
 0x40c   : > { %v1490_v57 = vunpack.c.l.b16 %v1255_v63  ;;  %v1252_v5 = vpack.c.bf16 %v1220_v34, %v1220_v34 }
 0x40d   : > { %v1489_v24 = vunpack.c.l.b16 %v1254_v27  ;;  %v1253_v33 = vpack.c.bf16 %v1221_v39, %v1221_v39 }
 0x40e   : > { %v1422_v35 = vunpack.c.l.b16 %v1252_v5 }
 0x40f   : > { %v1497_v7 = vpack.c.b16 %v1490_v57, %v1489_v24  ;;  %v1423_v13 = vunpack.c.l.b16 %v1253_v33 }
 0x410   : > { %v1506_v19 = vpop.permute.xlu1 %1505 }
 0x411   : > { %1530 = vmatpush.bf16.msrb.mxu2 %v1506_v19  ;;  %v1427_v53 = vpack.c.b16 %v1423_v13, %v1422_v35 }
 0x413   : > { %v1504_v55 = vpop.permute.xlu0 %1503  ;;  %v1332_v40 = vpop.f32.mrf.mxu2 }
 0x414   : > { %v1557_v31 = vpack.c.bf16 %v1332_v40, %v1330_v6 }
 0x415   : > { %1531 = vmatpush.bf16.msrb.mxu2 %v1504_v55 }
 0x416   : > { %2170 = vmatmul.msk.bf16.gmra.mxu1 %vm877_vm1, %v1426_v11  ;;  %2187 = vmatmul.msk.bf16.gmra.mxu3 %vm580_vm0, %v1557_v31 }
 0x419   : > { %1532 = vmatpush.bf16.msrb.mxu2 %v1502_v15 }
 0x41b   : > { %v1388_v28 = vpop.f32.mrf.mxu2 }
 0x41c   : > { %2172 = vmatmul.msk.bf16.vlgmr.msrb.gmra.mxu2 %vm877_vm1, %v1497_v7 }
 0x423   : > { %v1390_v51 = vpop.f32.mrf.mxu2 }
 0x424   : > { %v1558_v9 = vpack.c.bf16 %v1390_v51, %v1388_v28 }
 0x426   : > { %2171 = vmatmul.msk.bf16.gmra.mxu1 %vm877_vm1, %v1427_v53  ;;  %2188 = vmatmul.msk.bf16.gmra.mxu3 %vm580_vm0, %v1558_v9 }
 0x42b   : > { %v1393_v42 = vpop.f32.mrf.mxu2 }
 0x431   : > { %v1156_v56 = vpop.xlane.xlu2 %1155 }
 0x433   : > { %v1395_v16 = vpop.f32.mrf.mxu2 }
 0x434   : > { %v1559_v38 = vpack.c.bf16 %v1395_v16, %v1393_v42 }
 0x436   : > { %2189 = vmatmul.msk.bf16.gmra.mxu3 %vm580_vm0, %v1559_v38 }
 0x438   : > { %v3277_v46 = vpop.f32.mrf.mxu3 }
 0x43b   : > { %v1398_v17 = vpop.f32.mrf.mxu2  ;;  %v1153_v50 = vpop.xlane.xlu1 %1152 }
 0x43c   : > { %2426 = vrcp.f32 %v1153_v50 }
 0x440   : > { %v3279_v41 = vpop.f32.mrf.mxu3 }
 0x442   : > { %v2427_v43 = vpop.eup %2426 }
 0x443   : > { %v1400_v48 = vpop.f32.mrf.mxu2  ;;  %v1225_v59 = vmul.f32 %v2427_v43, %v3229_v23  ;;  %v1165_v54 = vpop.xlane.xlu1 %1164 }
 0x444   : > { %v1560_v20 = vpack.c.bf16 %v1400_v48, %v1398_v17 }
 0x445   : > { %v1257_v2 = vpack.c.bf16 %v1225_v59, %v1225_v59 }
 0x446   : > { %2190 = vmatmul.msk.bf16.gmra.mxu3 %vm580_vm0, %v1560_v20 }
 0x447   : > { %v1492_v61 = vunpack.c.l.b16 %v1257_v2 }
 0x448   : > { %v3282_v4 = vpop.f32.mrf.mxu3 }
 0x450   : > { %v3284_v21 = vpop.f32.mrf.mxu3 }
 0x456   : > { %v1150_v22 = vpop.xlane.xlu0 %1149 }
 0x457   : > { %2428 = vrcp.f32 %v1150_v22 }
 0x45d   : > { %v2429_v52 = vpop.eup %2428 }
 0x45e   : > { %v1224_v12 = vmul.f32 %v2429_v52, %v3244_v25  ;;  %v1159_v45 = vpop.xlane.xlu0 %1158 }
 0x45f   : > { %2430 = vrcp.f32 %v1159_v45 }
 0x460   : > { %v1256_v26 = vpack.c.bf16 %v1224_v12, %v1224_v12  ;;  %2432 = vrcp.f32 %v1156_v56 }
 0x461   : > { %v1403_v49 = vpop.f32.mrf.mxu2 }
 0x462   : > { %v1491_v62 = vunpack.c.l.b16 %v1256_v26 }
 0x464   : > { %v1498_v36 = vpack.c.b16 %v1492_v61, %v1491_v62 }
 0x465   : > { %v2431_v8 = vpop.eup %2430 }
 0x466   : > { %2173 = vmatmul.msk.bf16.gmra.mxu2 %vm877_vm1, %v1498_v36  ;;  %v2433_v30 = vpop.eup %2432  ;;  %v1227_v6 = vmul.f32 %v2431_v8, %v3249_v18 }
 0x467   : > { %v1226_v3 = vmul.f32 %v2433_v30, %v3224_v29 }
 0x468   : > { %v1259_v14 = vpack.c.bf16 %v1227_v6, %v1227_v6 }
 0x469   : > { %v1405_v23 = vpop.f32.mrf.mxu2  ;;  %v1258_v25 = vpack.c.bf16 %v1226_v3, %v1226_v3 }
 0x46a   : > { %v1561_v10 = vpack.c.bf16 %v1405_v23, %v1403_v49  ;;  %v1494_v60 = vunpack.c.l.b16 %v1259_v14 }
 0x46b   : > { %v1493_v1 = vunpack.c.l.b16 %v1258_v25 }
 0x46c   : > { %2191 = vmatmul.msk.bf16.gmra.mxu3 %vm580_vm0, %v1561_v10 }
 0x46d   : > { %v1499_v44 = vpack.c.b16 %v1494_v60, %v1493_v1 }
 0x46e   : > { %v1162_v32 = vpop.xlane.xlu2 %1161 }
 0x46f   : > { %2434 = vrcp.f32 %v1162_v32 }
 0x470   : > { %2436 = vrcp.f32 %v1165_v54 }
 0x473   : > { %v1461_v19 = vpop.f32.mrf.mxu1 }
 0x475   : > { %v2435_v63 = vpop.eup %2434 }
 0x476   : > { %2174 = vmatmul.msk.bf16.gmra.mxu2 %vm877_vm1, %v1499_v44  ;;  %v2437_v18 = vpop.eup %2436  ;;  %v1228_v55 = vmul.f32 %v2435_v63, %v3258_v47 }
 0x477   : > { %v1229_v29 = vmul.f32 %v2437_v18, %v3235_v0 }
 0x478   : > { %v1260_v27 = vpack.c.bf16 %v1228_v55, %v1228_v55 }
 0x479   : > { %v1261_v11 = vpack.c.bf16 %v1229_v29, %v1229_v29 }
 0x47a   : > { %v1495_v37 = vunpack.c.l.b16 %v1260_v27 }
 0x47b   : > { %v1463_v40 = vpop.f32.mrf.mxu1  ;;  %v1496_v57 = vunpack.c.l.b16 %v1261_v11 }
 0x47c   : > { %v1562_v31 = vpack.c.bf16 %v1463_v40, %v1461_v19 }
 0x47d   : > { %v1500_v34 = vpack.c.b16 %v1496_v57, %v1495_v37 }
 0x47e   : > { %2192 = vmatmul.msk.bf16.gmra.mxu3 %vm580_vm0, %v1562_v31 }
 0x483   : > { %v1466_v58 = vpop.f32.mrf.mxu1 }
 0x486   : > { %2175 = vmatmul.msk.bf16.gmra.mxu2 %vm877_vm1, %v1500_v34 }
 0x489   : > { %v3297_v15 = vpop.f32.mrf.mxu3 }
 0x48b   : > { %v1468_v24 = vpop.f32.mrf.mxu1 }
 0x48c   : > { %v1563_v39 = vpack.c.bf16 %v1468_v24, %v1466_v58 }
 0x48e   : > { %2193 = vmatmul.msk.bf16.gmra.mxu3 %vm580_vm0, %v1563_v39 }
 0x491   : > { %v3300_v47 = vpop.f32.mrf.mxu3 }
 0x493   : > { %v1471_v0 = vpop.f32.mrf.mxu1 }
 0x499   : > { %v3302_v7 = vpop.f32.mrf.mxu3 }
 0x49b   : > { %v1473_v28 = vpop.f32.mrf.mxu1 }
 0x49c   : > { %v1564_v5 = vpack.c.bf16 %v1473_v28, %v1471_v0 }
 0x49e   : > { %2194 = vmatmul.msk.bf16.gmra.mxu3 %vm580_vm0, %v1564_v5 }
 0x49f   : > { %v1534_v53 = vpop.f32.mrf.mxu2 }
 0x4a1   : > { %v3305_v33 = vpop.f32.mrf.mxu3 }
 0x4a3   : > { %v1476_v35 = vpop.f32.mrf.mxu1 }
 0x4a7   : > { %v1536_v16 = vpop.f32.mrf.mxu2 }
 0x4a8   : > { %v1566_v17 = vpack.c.bf16 %v1536_v16, %v1534_v53 }
 0x4a9   : > { %v3307_v13 = vpop.f32.mrf.mxu3 }
 0x4ab   : > { %v1478_v51 = vpop.f32.mrf.mxu1 }
 0x4ac   : > { %v1565_v9 = vpack.c.bf16 %v1478_v51, %v1476_v35 }
 0x4ae   : > { %2195 = vmatmul.msk.bf16.gmra.mxu3 %vm580_vm0, %v1565_v9 }
 0x4b1   : > { %v3310_v42 = vpop.f32.mrf.mxu3 }
 0x4b9   : > { %v3312_v38 = vpop.f32.mrf.mxu3 }
 0x4be   : > { %2196 = vmatmul.msk.bf16.gmra.mxu3 %vm580_vm0, %v1566_v17 }
 0x4c1   : > { %v3315_v48 = vpop.f32.mrf.mxu3 }
 0x4c9   : > { %v3317_v20 = vpop.f32.mrf.mxu3 }
 0x4d1   : > { %v3319_v50 = vpop.f32.mrf.mxu3 }
 0x4e9   : > { %v1539_v22 = vpop.f32.mrf.mxu2 }
 0x4ef   : > { %v3321_v43 = vpop.f32.mrf.mxu3 }
 0x4f1   : > { %v1541_v59 = vpop.f32.mrf.mxu2 }
 0x4f2   : > { %v1567_v52 = vpack.c.bf16 %v1541_v59, %v1539_v22 }
 0x4f4   : > { %2197 = vmatmul.msk.bf16.gmra.mxu3 %vm580_vm0, %v1567_v52 }
 0x4f7   : > { %v3324_v56 = vpop.f32.mrf.mxu3 }
 0x4f9   : > { %v1544_v2 = vpop.f32.mrf.mxu2 }
 0x501   : > { %v1546_v12 = vpop.f32.mrf.mxu2  ;;  %v3326_v45 = vpop.f32.mrf.mxu3 }
 0x502   : > { %v1568_v26 = vpack.c.bf16 %v1546_v12, %v1544_v2 }
 0x504   : > { %2198 = vmatmul.msk.bf16.gmra.mxu3 %vm580_vm0, %v1568_v26 }
 0x509   : > { %v1549_v49 = vpop.f32.mrf.mxu2  ;;  %v3329_v61 = vpop.f32.mrf.mxu3 }
 0x511   : > { %v1551_v62 = vpop.f32.mrf.mxu2  ;;  %v3331_v36 = vpop.f32.mrf.mxu3 }
 0x512   : > { %v1569_v8 = vpack.c.bf16 %v1551_v62, %v1549_v49 }
 0x514   : > { %2199 = vmatmul.msk.bf16.gmra.mxu3 %vm580_vm0, %v1569_v8 }
 0x519   : > { %v3334_v30 = vpop.f32.mrf.mxu3 }
 0x521   : > { %v3336_v6 = vpop.f32.mrf.mxu3 }
 0x529   : > { %v3338_v23 = vpop.f32.mrf.mxu3 }
 0x531   : > { %v3340_v3 = vpop.f32.mrf.mxu3 }
 0x539   : > { %v3342_v10 = vpop.f32.mrf.mxu3 }
 0x541   : > { %v3344_v14 = vpop.f32.mrf.mxu3 }
 0x549   : > { %v3346_v25 = vpop.f32.mrf.mxu3 }
 0x577   : > { %v3348_v54 = vpop.f32.mrf.mxu3 }
 0x57f   : > { %v3350_v32 = vpop.f32.mrf.mxu3 }
 0x587   : > { %v3352_v60 = vpop.f32.mrf.mxu3 }
 0x58f   : > { %v3354_v1 = vpop.f32.mrf.mxu3 }
 0x597   : > { %v3356_v19 = vpop.f32.mrf.mxu3 }
 0x59b   : > { %1726 = sbr.rel (%p2200_p5) target bundleno = 1475 (0x5c3), region = 48 }
 0x59f   : > { %v3358_v44 = vpop.f32.mrf.mxu3 }
 0x5a0   : > { %v2438_v63 = vld [vmem:[%s3514_s4] ss:$0 sm:$0xff] }
 0x5a1   : > { %v1731_v18 = vadd.f32 %v2438_v63, %v3277_v46  ;;  %v1732_v55 = vadd.f32 %v2438_v63, %v3279_v41  ;;  %v1733_v29 = vadd.f32 %v2438_v63, %v3282_v4  ;;  %v1734_v40 = vadd.f32 %v2438_v63, %v3284_v21 }
 0x5a2   : > { %v1735_v27 = vadd.f32 %v2438_v63, %v3297_v15  ;;  %v1736_v31 = vadd.f32 %v2438_v63, %v3300_v47  ;;  %v1737_v11 = vadd.f32 %v2438_v63, %v3302_v7  ;;  %v1738_v37 = vadd.f32 %v2438_v63, %v3305_v33 }
 0x5a3   : > { %1763 = vst [vmem:[#allocation2 + $0xb0] sm:$0xff] %v1731_v18  ;;  %v1739_v57 = vadd.f32 %v2438_v63, %v3307_v13  ;;  %v1740_v58 = vadd.f32 %v2438_v63, %v3310_v42  ;;  %v1741_v34 = vadd.f32 %v2438_v63, %v3312_v38  ;;  %v1742_v24 = vadd.f32 %v2438_v63, %v3315_v48 }
 0x5a4   : > { %1764 = vst [vmem:[#allocation2] sm:$0xff] %v1732_v55  ;;  %v1743_v39 = vadd.f32 %v2438_v63, %v3317_v20  ;;  %v1744_v0 = vadd.f32 %v2438_v63, %v3319_v50  ;;  %v1745_v28 = vadd.f32 %v2438_v63, %v3321_v43  ;;  %v1746_v5 = vadd.f32 %v2438_v63, %v3324_v56 }
 0x5a5   : > { %1765 = vst [vmem:[#allocation2 + $0xd8] sm:$0xff] %v1733_v29  ;;  %v1747_v35 = vadd.f32 %v2438_v63, %v3326_v45  ;;  %v1748_v51 = vadd.f32 %v2438_v63, %v3329_v61  ;;  %v1749_v9 = vadd.f32 %v2438_v63, %v3331_v36  ;;  %v1750_v53 = vadd.f32 %v2438_v63, %v3334_v30 }
 0x5a6   : > { %1766 = vst [vmem:[#allocation2 + $0x18] sm:$0xff] %v1734_v40  ;;  %v1751_v16 = vadd.f32 %v2438_v63, %v3336_v6  ;;  %v1752_v17 = vadd.f32 %v2438_v63, %v3338_v23  ;;  %v1753_v22 = vadd.f32 %v2438_v63, %v3340_v3  ;;  %v1754_v59 = vadd.f32 %v2438_v63, %v3342_v10 }
 0x5a7   : > { %1767 = vst [vmem:[#allocation2 + $0x50] sm:$0xff] %v1735_v27  ;;  %v1755_v52 = vadd.f32 %v2438_v63, %v3344_v14  ;;  %v1756_v2 = vadd.f32 %v2438_v63, %v3346_v25  ;;  %v1757_v12 = vadd.f32 %v2438_v63, %v3348_v54  ;;  %v1758_v26 = vadd.f32 %v2438_v63, %v3350_v32 }
 0x5a8   : > { %1768 = vst [vmem:[#allocation2 + $0x68] sm:$0xff] %v1736_v31  ;;  %v1759_v49 = vadd.f32 %v2438_v63, %v3352_v60  ;;  %v1760_v62 = vadd.f32 %v2438_v63, %v3354_v1  ;;  %v1761_v8 = vadd.f32 %v2438_v63, %v3356_v19  ;;  %v1762_v18 = vadd.f32 %v2438_v63, %v3358_v44 }
 0x5a9   : > { %1769 = vst [vmem:[#allocation2 + $0x30] sm:$0xff] %v1737_v11 }
 0x5aa   : > { %1770 = vst [vmem:[#allocation2 + $0x48] sm:$0xff] %v1738_v37 }
 0x5ab   : > { %1771 = vst [vmem:[#allocation2 + $0x80] sm:$0xff] %v1739_v57 }
 0x5ac   : > { %1772 = vst [vmem:[#allocation2 + $0x88] sm:$0xff] %v1740_v58 }
 0x5ad   : > { %1773 = vst [vmem:[#allocation2 + $0xe8] sm:$0xff] %v1741_v34 }
 0x5ae   : > { %1774 = vst [vmem:[#allocation2 + $0xb8] sm:$0xff] %v1742_v24 }
 0x5af   : > { %1775 = vst [vmem:[#allocation2 + $0x60] sm:$0xff] %v1743_v39 }
 0x5b0   : > { %1776 = vst [vmem:[#allocation2 + $0xf0] sm:$0xff] %v1744_v0 }
 0x5b1   : > { %1777 = vst [vmem:[#allocation2 + $0x8] sm:$0xff] %v1745_v28 }
 0x5b2   : > { %1778 = vst [vmem:[#allocation2 + $0x78] sm:$0xff] %v1746_v5 }
 0x5b3   : > { %1779 = vst [vmem:[#allocation2 + $0x38] sm:$0xff] %v1747_v35 }
 0x5b4   : > { %1780 = vst [vmem:[#allocation2 + $0x58] sm:$0xff] %v1748_v51 }
 0x5b5   : > { %1781 = vst [vmem:[#allocation2 + $0x40] sm:$0xff] %v1749_v9 }
 0x5b6   : > { %1782 = vst [vmem:[#allocation2 + $0xc8] sm:$0xff] %v1750_v53 }
 0x5b7   : > { %1783 = vst [vmem:[#allocation2 + $0xe0] sm:$0xff] %v1751_v16 }
 0x5b8   : > { %1784 = vst [vmem:[#allocation2 + $0x90] sm:$0xff] %v1752_v17 }
 0x5b9   : > { %1785 = vst [vmem:[#allocation2 + $0x70] sm:$0xff] %v1753_v22 }
 0x5ba   : > { %1786 = vst [vmem:[#allocation2 + $0xc0] sm:$0xff] %v1754_v59 }
 0x5bb   : > { %1787 = vst [vmem:[#allocation2 + $0xa8] sm:$0xff] %v1755_v52 }
 0x5bc   : > { %1788 = vst [vmem:[#allocation2 + $0xd0] sm:$0xff] %v1756_v2 }
 0x5bd   : > { %1789 = vst [vmem:[#allocation2 + $0x10] sm:$0xff] %v1757_v12 }
 0x5be   : > { %1790 = vst [vmem:[#allocation2 + $0x28] sm:$0xff] %v1758_v26 }
 0x5bf   : > { %1791 = vst [vmem:[#allocation2 + $0xa0] sm:$0xff] %v1759_v49 }
 0x5c0   : > { %1792 = vst [vmem:[#allocation2 + $0xf8] sm:$0xff] %v1760_v62 }
 0x5c1   : > { %1793 = vst [vmem:[#allocation2 + $0x20] sm:$0xff] %v1761_v8 }
 0x5c2   : > { %1794 = vst [vmem:[#allocation2 + $0x98] sm:$0xff] %v1762_v18 }
 0x5c3 PF: > { %p2201_p6 = scmp.le.s32.totalorder %s2551_s21, 0 }
 0x5c5   : > { %1798 = sbr.rel (%p2201_p6) target bundleno = 1517 (0x5ed), region = 52 }
 0x5ca   : > { %v1799_v55 = vld [vmem:[#allocation2 + $0xb0] sm:$0xff]  ;;  %v1800_v29 = vld [vmem:[#allocation2] sm:$0xff]  ;;  %v1801_v40 = vld [vmem:[#allocation2 + $0xd8] sm:$0xff] }
 0x5cb   : > { %v1831_v27 = vadd.f32 %v1799_v55, %v3277_v46  ;;  %v1832_v31 = vadd.f32 %v1800_v29, %v3279_v41  ;;  %v1833_v11 = vadd.f32 %v1801_v40, %v3282_v4  ;;  %v1802_v37 = vld [vmem:[#allocation2 + $0x18] sm:$0xff]  ;;  %v1803_v57 = vld [vmem:[#allocation2 + $0x50] sm:$0xff]  ;;  %v1804_v63 = vld [vmem:[#allocation2 + $0x68] sm:$0xff] }
 0x5cc   : > { %v1834_v58 = vadd.f32 %v1802_v37, %v3284_v21  ;;  %v1805_v34 = vld [vmem:[#allocation2 + $0x30] sm:$0xff]  ;;  %v1835_v24 = vadd.f32 %v1803_v57, %v3297_v15  ;;  %v1806_v39 = vld [vmem:[#allocation2 + $0x48] sm:$0xff]  ;;  %v1836_v0 = vadd.f32 %v1804_v63, %v3300_v47  ;;  %v1807_v28 = vld [vmem:[#allocation2 + $0x80] sm:$0xff] }
 0x5cd   : > { %1863 = vst [vmem:[#allocation2 + $0xb0] sm:$0xff] %v1831_v27  ;;  %v1837_v46 = vadd.f32 %v1805_v34, %v3302_v7  ;;  %v1808_v41 = vld [vmem:[#allocation2 + $0x88] sm:$0xff]  ;;  %v1838_v4 = vadd.f32 %v1806_v39, %v3305_v33  ;;  %v1839_v21 = vadd.f32 %v1807_v28, %v3307_v13  ;;  %v1810_v35 = vld [vmem:[#allocation2 + $0xb8] sm:$0xff]  ;;  %v1811_v51 = vld [vmem:[#allocation2 + $0x60] sm:$0xff] }
 0x5ce   : > { %1864 = vst [vmem:[#allocation2] sm:$0xff] %v1832_v31  ;;  %v1809_v5 = vld [vmem:[#allocation2 + $0xe8] sm:$0xff]  ;;  %v1840_v15 = vadd.f32 %v1808_v41, %v3310_v42  ;;  %v1812_v9 = vld [vmem:[#allocation2 + $0xf0] sm:$0xff]  ;;  %v1842_v7 = vadd.f32 %v1810_v35, %v3315_v48  ;;  %v1843_v33 = vadd.f32 %v1811_v51, %v3317_v20  ;;  %v1814_v16 = vld [vmem:[#allocation2 + $0x78] sm:$0xff] }
 0x5cf   : > { %1865 = vst [vmem:[#allocation2 + $0xd8] sm:$0xff] %v1833_v11  ;;  %v1841_v47 = vadd.f32 %v1809_v5, %v3312_v38  ;;  %v1813_v53 = vld [vmem:[#allocation2 + $0x8] sm:$0xff]  ;;  %v1844_v13 = vadd.f32 %v1812_v9, %v3319_v50  ;;  %v1815_v17 = vld [vmem:[#allocation2 + $0x38] sm:$0xff]  ;;  %v1846_v38 = vadd.f32 %v1814_v16, %v3324_v56  ;;  %v1817_v59 = vld [vmem:[#allocation2 + $0x40] sm:$0xff] }
 0x5d0   : > { %1866 = vst [vmem:[#allocation2 + $0x18] sm:$0xff] %v1834_v58  ;;  %v1845_v42 = vadd.f32 %v1813_v53, %v3321_v43  ;;  %v1816_v22 = vld [vmem:[#allocation2 + $0x58] sm:$0xff]  ;;  %v1847_v48 = vadd.f32 %v1815_v17, %v3326_v45  ;;  %v1818_v52 = vld [vmem:[#allocation2 + $0xc8] sm:$0xff]  ;;  %v1819_v2 = vld [vmem:[#allocation2 + $0xe0] sm:$0xff]  ;;  %v1849_v50 = vadd.f32 %v1817_v59, %v3331_v36 }
 0x5d1   : > { %1867 = vst [vmem:[#allocation2 + $0x50] sm:$0xff] %v1835_v24  ;;  %v1848_v20 = vadd.f32 %v1816_v22, %v3329_v61  ;;  %v1820_v12 = vld [vmem:[#allocation2 + $0x90] sm:$0xff]  ;;  %v1850_v43 = vadd.f32 %v1818_v52, %v3334_v30  ;;  %v1851_v56 = vadd.f32 %v1819_v2, %v3336_v6  ;;  %v1822_v49 = vld [vmem:[#allocation2 + $0xc0] sm:$0xff]  ;;  %v1823_v62 = vld [vmem:[#allocation2 + $0xa8] sm:$0xff] }
 0x5d2   : > { %1868 = vst [vmem:[#allocation2 + $0x68] sm:$0xff] %v1836_v0  ;;  %v1821_v26 = vld [vmem:[#allocation2 + $0x70] sm:$0xff]  ;;  %v1852_v45 = vadd.f32 %v1820_v12, %v3338_v23  ;;  %v1854_v36 = vadd.f32 %v1822_v49, %v3342_v10  ;;  %v1855_v30 = vadd.f32 %v1823_v62, %v3344_v14  ;;  %v1826_v55 = vld [vmem:[#allocation2 + $0x28] sm:$0xff]  ;;  %v1827_v29 = vld [vmem:[#allocation2 + $0xa0] sm:$0xff] }
 0x5d3   : > { %1869 = vst [vmem:[#allocation2 + $0x30] sm:$0xff] %v1837_v46  ;;  %v1853_v61 = vadd.f32 %v1821_v26, %v3340_v3  ;;  %v1824_v8 = vld [vmem:[#allocation2 + $0xd0] sm:$0xff]  ;;  %v1828_v40 = vld [vmem:[#allocation2 + $0xf8] sm:$0xff]  ;;  %v1858_v3 = vadd.f32 %v1826_v55, %v3350_v32  ;;  %v1829_v27 = vld [vmem:[#allocation2 + $0x20] sm:$0xff]  ;;  %v1859_v10 = vadd.f32 %v1827_v29, %v3352_v60 }
 0x5d4   : > { %1870 = vst [vmem:[#allocation2 + $0x48] sm:$0xff] %v1838_v4  ;;  %v1825_v18 = vld [vmem:[#allocation2 + $0x10] sm:$0xff]  ;;  %v1856_v6 = vadd.f32 %v1824_v8, %v3346_v25  ;;  %v1830_v31 = vld [vmem:[#allocation2 + $0x98] sm:$0xff]  ;;  %v1860_v14 = vadd.f32 %v1828_v40, %v3354_v1  ;;  %v1861_v11 = vadd.f32 %v1829_v27, %v3356_v19 }
 0x5d5   : > { %1871 = vst [vmem:[#allocation2 + $0x80] sm:$0xff] %v1839_v21  ;;  %v1857_v23 = vadd.f32 %v1825_v18, %v3348_v54  ;;  %v1862_v25 = vadd.f32 %v1830_v31, %v3358_v44 }
 0x5d6   : > { %1872 = vst [vmem:[#allocation2 + $0x88] sm:$0xff] %v1840_v15 }
 0x5d7   : > { %1873 = vst [vmem:[#allocation2 + $0xe8] sm:$0xff] %v1841_v47 }
 0x5d8   : > { %1874 = vst [vmem:[#allocation2 + $0xb8] sm:$0xff] %v1842_v7 }
 0x5d9   : > { %1875 = vst [vmem:[#allocation2 + $0x60] sm:$0xff] %v1843_v33 }
 0x5da   : > { %1876 = vst [vmem:[#allocation2 + $0xf0] sm:$0xff] %v1844_v13 }
 0x5db   : > { %1877 = vst [vmem:[#allocation2 + $0x8] sm:$0xff] %v1845_v42 }
 0x5dc   : > { %1878 = vst [vmem:[#allocation2 + $0x78] sm:$0xff] %v1846_v38 }
 0x5dd   : > { %1879 = vst [vmem:[#allocation2 + $0x38] sm:$0xff] %v1847_v48 }
 0x5de   : > { %1880 = vst [vmem:[#allocation2 + $0x58] sm:$0xff] %v1848_v20 }
 0x5df   : > { %1881 = vst [vmem:[#allocation2 + $0x40] sm:$0xff] %v1849_v50 }
 0x5e0   : > { %1882 = vst [vmem:[#allocation2 + $0xc8] sm:$0xff] %v1850_v43 }
 0x5e1   : > { %1883 = vst [vmem:[#allocation2 + $0xe0] sm:$0xff] %v1851_v56 }
 0x5e2   : > { %1884 = vst [vmem:[#allocation2 + $0x90] sm:$0xff] %v1852_v45 }
 0x5e3   : > { %1885 = vst [vmem:[#allocation2 + $0x70] sm:$0xff] %v1853_v61 }
 0x5e4   : > { %1886 = vst [vmem:[#allocation2 + $0xc0] sm:$0xff] %v1854_v36 }
 0x5e5   : > { %1887 = vst [vmem:[#allocation2 + $0xa8] sm:$0xff] %v1855_v30 }
 0x5e6   : > { %1888 = vst [vmem:[#allocation2 + $0xd0] sm:$0xff] %v1856_v6 }
 0x5e7   : > { %1889 = vst [vmem:[#allocation2 + $0x10] sm:$0xff] %v1857_v23 }
 0x5e8   : > { %1890 = vst [vmem:[#allocation2 + $0x28] sm:$0xff] %v1858_v3 }
 0x5e9   : > { %1891 = vst [vmem:[#allocation2 + $0xa0] sm:$0xff] %v1859_v10 }
 0x5ea   : > { %1892 = vst [vmem:[#allocation2 + $0xf8] sm:$0xff] %v1860_v14 }
 0x5eb   : > { %1893 = vst [vmem:[#allocation2 + $0x20] sm:$0xff] %v1861_v11 }
 0x5ec   : > { %1894 = vst [vmem:[#allocation2 + $0x98] sm:$0xff] %v1862_v25 }
 0x5ed PF: > { %p2202_p7 = scmp.ne.s32.totalorder %s2551_s21, 3 }
 0x5ef   : > { %1898 = sbr.rel (%p2202_p7) target bundleno = 1557 (0x615), region = 56 }
 0x5f4   : > { %v1899_v54 = vld [vmem:[#allocation2 + $0xb0] sm:$0xff]  ;;  %v1900_v32 = vld [vmem:[#allocation2] sm:$0xff]  ;;  %v1901_v60 = vld [vmem:[#allocation2 + $0xd8] sm:$0xff] }
 0x5f5   : > { %1931 = vst [vmem:[%s3362_s23] sm:$0xff] %v1899_v54  ;;  %v1902_v1 = vld [vmem:[#allocation2 + $0x18] sm:$0xff]  ;;  %v1903_v19 = vld [vmem:[#allocation2 + $0x50] sm:$0xff]  ;;  %v1904_v44 = vld [vmem:[#allocation2 + $0x68] sm:$0xff] }
 0x5f6   : > { %1932 = vst [vmem:[%s3362_s23 + $0x8] sm:$0xff] %v1900_v32  ;;  %v1905_v37 = vld [vmem:[#allocation2 + $0x30] sm:$0xff]  ;;  %v1906_v57 = vld [vmem:[#allocation2 + $0x48] sm:$0xff]  ;;  %v1907_v63 = vld [vmem:[#allocation2 + $0x80] sm:$0xff] }
 0x5f7   : > { %1933 = vst [vmem:[%s3362_s23 + $0x10] sm:$0xff] %v1901_v60  ;;  %v1908_v58 = vld [vmem:[#allocation2 + $0x88] sm:$0xff]  ;;  %v1910_v24 = vld [vmem:[#allocation2 + $0xb8] sm:$0xff]  ;;  %v1911_v39 = vld [vmem:[#allocation2 + $0x60] sm:$0xff] }
 0x5f8   : > { %1934 = vst [vmem:[%s3362_s23 + $0x18] sm:$0xff] %v1902_v1  ;;  %v1909_v34 = vld [vmem:[#allocation2 + $0xe8] sm:$0xff]  ;;  %v1912_v0 = vld [vmem:[#allocation2 + $0xf0] sm:$0xff]  ;;  %v1914_v46 = vld [vmem:[#allocation2 + $0x78] sm:$0xff] }
 0x5f9   : > { %1935 = vst [vmem:[%s3362_s23 + $0x20] sm:$0xff] %v1903_v19  ;;  %v1913_v28 = vld [vmem:[#allocation2 + $0x8] sm:$0xff]  ;;  %v1915_v41 = vld [vmem:[#allocation2 + $0x38] sm:$0xff]  ;;  %v1917_v5 = vld [vmem:[#allocation2 + $0x40] sm:$0xff] }
 0x5fa   : > { %1936 = vst [vmem:[%s3362_s23 + $0x28] sm:$0xff] %v1904_v44  ;;  %v1916_v4 = vld [vmem:[#allocation2 + $0x58] sm:$0xff]  ;;  %v1918_v21 = vld [vmem:[#allocation2 + $0xc8] sm:$0xff]  ;;  %v1919_v35 = vld [vmem:[#allocation2 + $0xe0] sm:$0xff] }
 0x5fb   : > { %1937 = vst [vmem:[%s3362_s23 + $0x30] sm:$0xff] %v1905_v37  ;;  %v1920_v15 = vld [vmem:[#allocation2 + $0x90] sm:$0xff]  ;;  %v1922_v47 = vld [vmem:[#allocation2 + $0xc0] sm:$0xff]  ;;  %v1923_v9 = vld [vmem:[#allocation2 + $0xa8] sm:$0xff] }
 0x5fc   : > { %1938 = vst [vmem:[%s3362_s23 + $0x38] sm:$0xff] %v1906_v57  ;;  %v1921_v51 = vld [vmem:[#allocation2 + $0x70] sm:$0xff]  ;;  %v1926_v33 = vld [vmem:[#allocation2 + $0x28] sm:$0xff]  ;;  %v1927_v16 = vld [vmem:[#allocation2 + $0xa0] sm:$0xff] }
 0x5fd   : > { %1939 = vst [vmem:[%s3362_s23 + $0x40] sm:$0xff] %v1907_v63  ;;  %v1924_v7 = vld [vmem:[#allocation2 + $0xd0] sm:$0xff]  ;;  %v1928_v13 = vld [vmem:[#allocation2 + $0xf8] sm:$0xff]  ;;  %v1929_v17 = vld [vmem:[#allocation2 + $0x20] sm:$0xff] }
 0x5fe   : > { %1940 = vst [vmem:[%s3362_s23 + $0x48] sm:$0xff] %v1908_v58  ;;  %v1925_v53 = vld [vmem:[#allocation2 + $0x10] sm:$0xff]  ;;  %v1930_v42 = vld [vmem:[#allocation2 + $0x98] sm:$0xff] }
 0x5ff   : > { %1941 = vst [vmem:[%s3362_s23 + $0x50] sm:$0xff] %v1909_v34 }
 0x600   : > { %1942 = vst [vmem:[%s3362_s23 + $0x58] sm:$0xff] %v1910_v24 }
 0x601   : > { %1943 = vst [vmem:[%s3362_s23 + $0x60] sm:$0xff] %v1911_v39 }
 0x602   : > { %1944 = vst [vmem:[%s3362_s23 + $0x68] sm:$0xff] %v1912_v0 }
 0x603   : > { %1945 = vst [vmem:[%s3362_s23 + $0x70] sm:$0xff] %v1913_v28 }
 0x604   : > { %1946 = vst [vmem:[%s3362_s23 + $0x78] sm:$0xff] %v1914_v46 }
 0x605   : > { %1947 = vst [vmem:[%s3362_s23 + $0x80] sm:$0xff] %v1915_v41 }
 0x606   : > { %1948 = vst [vmem:[%s3362_s23 + $0x88] sm:$0xff] %v1916_v4 }
 0x607   : > { %1949 = vst [vmem:[%s3362_s23 + $0x90] sm:$0xff] %v1917_v5 }
 0x608   : > { %1950 = vst [vmem:[%s3362_s23 + $0x98] sm:$0xff] %v1918_v21 }
 0x609   : > { %1951 = vst [vmem:[%s3362_s23 + $0xa0] sm:$0xff] %v1919_v35 }
 0x60a   : > { %1952 = vst [vmem:[%s3362_s23 + $0xa8] sm:$0xff] %v1920_v15 }
 0x60b   : > { %1953 = vst [vmem:[%s3362_s23 + $0xb0] sm:$0xff] %v1921_v51 }
 0x60c   : > { %1954 = vst [vmem:[%s3362_s23 + $0xb8] sm:$0xff] %v1922_v47 }
 0x60d   : > { %1955 = vst [vmem:[%s3362_s23 + $0xc0] sm:$0xff] %v1923_v9 }
 0x60e   : > { %1956 = vst [vmem:[%s3362_s23 + $0xc8] sm:$0xff] %v1924_v7 }
 0x60f   : > { %1957 = vst [vmem:[%s3362_s23 + $0xd0] sm:$0xff] %v1925_v53 }
 0x610   : > { %1958 = vst [vmem:[%s3362_s23 + $0xd8] sm:$0xff] %v1926_v33 }
 0x611   : > { %1959 = vst [vmem:[%s3362_s23 + $0xe0] sm:$0xff] %v1927_v16 }
 0x612   : > { %1960 = vst [vmem:[%s3362_s23 + $0xe8] sm:$0xff] %v1928_v13 }
 0x613   : > { %1961 = vst [vmem:[%s3362_s23 + $0xf0] sm:$0xff] %v1929_v17 }
 0x614   : > { %1962 = vst [vmem:[%s3362_s23 + $0xf8] sm:$0xff] %v1930_v42 }
 0x615 PF: > { %s2224_s21 = sshll.u32 %s2555_s22, 8  ;;  %s1977_s7 = sshll.u32 %s3362_s23, 4  ;;  %s1978_s7 = int_to_ptr.vmem [resolvable:$true] %s1977_s7 }
 0x616   : > { %s1976_s26 = scalar_lea.hbm %s3515_s5, %s2224_s21  ;;  %s1964_s9 = scalar_lea.sflag [#allocation5], %s2692_s30 }
 0x617   : > { %s1979_s27 = sshll.u32 %s1976_s26, 4  ;;  %s2489_s22 = scalar_lea.hbm %s3515_s5, 512  ;;  %s1980_s27 = int_to_ptr.hbm [resolvable:$true] %s1979_s27 }
 0x618   : > { %s2483_s14 = sshra.s32 %s1980_s27, 4  ;;  %s2484_s14 = int_to_ptr.hbm [resolvable:$true] %s2483_s14 }
 0x619   : > { %s2485_s6 = scalar_lea.hbm %s2484_s14, 256  ;;  %p2490_p13 = scmp.lt.s32.totalorder %s2484_s14, %s3515_s5 }
 0x61a   : > { %p2486_p8 = scmp.ne.s32.totalorder %s2484_s14, %s2485_s6  ;;  %p2491_p0 = scmp.lt.s32.totalorder %s2489_s22, %s2485_s6 }
 0x61c   : > { %p2487_p9 = pnand %p2486_p8, %p2668_p10  ;;  %p2492_p1 = por %p2491_p0, %p2490_p13 }
 0x61e   : > { %p2488_p12 = pneg %p2487_p9 }
 0x620   : > { %p2493_p2 = pnand %p2492_p1, %p2488_p12 }
 0x622   : > { %2496 = shalt.err (!%p2493_p2)
}
 0x623   : > { %s2573_s30 = smov 128   ;;  %s2574_s23 = smov 8  }
 0x624   : > { %2227 = dma.vmem_to_hbm [thread:$0]  (%p2668_p10), %s1978_s7, 4096, %s1980_s27, %s1964_s9, %s2573_s30, %s2573_s30, %s2574_s23  }
 0x625 PF: > { %p2238_p4 = scmp.ge.s32.totalorder %s2567_s25, 2  ;;  %s1994_s16 = sand.u32 1, %s2539_s18  }
 0x626   : > { %s1995_s21 = scalar_lea.sflag [#allocation5], %s1994_s16 }
 0x627   : > { %p2234_p3 = pnand %p2238_p4, %p2674_p11 }
 0x629   : > { %p2235_p5 = pneg %p2234_p3 }
 0x62b   : > { %2534 = dma.done.wait (%p2235_p5), %s1995_s21, 4096  }
 0x62c   : > { %2536 = vsyncadd (%p2235_p5), %s1995_s21, 4294963200  ;;  %s21_s25 = sadd.s32 1, %s2567_s25   ;;  %s3525_s21 = sld [smem:[#allocation9_spill]] }
 0x62d   : > { %p18_p6 = scmp.ge.s32.totalorder %s21_s25, 10   ;;  %s3526_s23 = sld [smem:[#allocation10_spill]] }
 0x62e   : > { %s3527_s8 = sld [smem:[#allocation11_spill]]  ;;  %s3528_s18 = smov %s2543_s19 }
 0x62f   : > { %s3529_s19 = smov %s2547_s20  ;;  %s3530_s20 = smov %s2681_s12 }
 0x630   : > { %s3531_s22 = smov %s2563_s24  ;;  %20 = sbr.rel (!%p18_p6) target bundleno = 7 (0x7), region = 106 }
 0x634   : > { %s3532_s24 = smov %s3527_s8 }
 0x635   :  { %2001 = vsyncpa [#allocation4], 1 }
 0x636   :  { %2003 = vsyncpa [#allocation4 + $0x1], 1 }
 0x637   :  { %2004 = vsyncpa [#allocation5], 1 }
 0x638   :  { %2006 = vsyncpa [#allocation5 + $0x1], 1 }

</bundles_post_ra>
